<compile_context>
chip_gen: v6e
topology: v6e:2x2x1
jax: 0.10.0
libtpu: 0.0.40
codegen_flags: <defaults>
</compile_context>

<pallas_src>
import functools

import jax
import jax.numpy as jnp
from jax import lax
from jax.experimental import pallas as pl
from jax.experimental.pallas import tpu as pltpu

HEADS = 4
DIM_HEAD = 32
BN_EPS = 1e-5
LANE = 128


def _round_up(x, m):
    return (x + m - 1) // m * m


def _choose_group_block(B, cap=32):
    """Largest divisor of B that is <= cap and keeps >= 2 grid steps."""
    best = 1
    for g in range(1, min(B, cap) + 1):
        if B % g == 0 and (B // g >= 2 or B == 1):
            best = g
    return best


# ----------------------------- Pallas kernel -------------------------------
def _pre_extraction_kernel(
    x_ref,                      # (G, S, Cp) bf16   G point-groups, channel-last
    w1_ref, b1_ref,             # (Cp, Cp) bf16, (1, Cp) f32   res conv1 (+BN)
    w2_ref, b2_ref,             # (Cp, Cp) bf16, (1, Cp) f32   res conv2 (+BN)
    wqkv_ref,                   # (Cp, 3*inner) bf16           to_qkv (no bias)
    wout_ref, bout_ref,         # (inner, Cp) bf16, (1, Cp) f32 attn to_out (+BN)
    wffn_ref, bffn_ref,         # (Cp, Cp) bf16, (1, Cp) f32   ffn conv (+BN)
    out_ref,                    # (1, G, Cp) f32               max-pooled out
    *, heads, dim_head):
    G, S, Cp = x_ref.shape
    inner = heads * dim_head
    scale = dim_head ** -0.5

    def mm(a_f32, w_ref):        # bf16 MXU inputs, f32 accumulation
        return jnp.dot(a_f32.astype(jnp.bfloat16), w_ref[...],
                       preferred_element_type=jnp.float32)

    x = x_ref[...].astype(jnp.float32).reshape(G * S, Cp)     # (GS, Cp)

    # --- FCBNReLU1DRes: relu(BN2(W2 relu(BN1(W1 x))) + x) ---
    h = jnp.maximum(mm(x, w1_ref) + b1_ref[...], 0.0)
    x1 = jnp.maximum(mm(h, w2_ref) + b2_ref[...] + x, 0.0)    # (GS, Cp)

    # --- Attention over the S points of each group, batched over G groups ---
    qkv = mm(x1, wqkv_ref).reshape(G, S, 3 * inner)           # (G, S, 3*inner)

    head_outs = []
    for hd in range(heads):                                   # static unroll
        q0 = hd * dim_head
        qh = qkv[:, :, q0:q0 + dim_head].astype(jnp.bfloat16)
        kh = qkv[:, :, inner + q0:inner + q0 + dim_head].astype(jnp.bfloat16)
        vh = qkv[:, :, 2 * inner + q0:2 * inner + q0 + dim_head].astype(jnp.bfloat16)
        dots = jnp.einsum('gid,gjd->gij', qh, kh,
                          preferred_element_type=jnp.float32) * scale
        dots = dots - jnp.max(dots, axis=-1, keepdims=True)
        e = jnp.exp(dots)
        denom = jnp.sum(e, axis=-1, keepdims=True)
        attn = e * pl.reciprocal(denom, approx=True)
        head_outs.append(
            jnp.einsum('gij,gjd->gid', attn.astype(jnp.bfloat16), vh,
                       preferred_element_type=jnp.float32))
    o = jnp.concatenate(head_outs, axis=-1).reshape(G * S, inner)  # (h d) order

    att = jnp.maximum(mm(o, wout_ref) + bout_ref[...] + x1, 0.0)   # (GS, Cp)

    # --- FFN + residual ---
    f = mm(att, wffn_ref) + bffn_ref[...]
    out = jnp.maximum(att + f, 0.0)                                # (GS, Cp)

    # --- adaptive_max_pool1d(., 1): max over the S points of each group ---
    out_ref[0] = jnp.max(out.reshape(G, S, Cp), axis=1)            # (G, Cp)


# ----------------------------- host wrapper --------------------------------
def pre_extraction_forward(x, params, *, heads=HEADS, dim_head=DIM_HEAD,
                           max_groups_per_step=32):
    """x: (b, n, s, d) float32 (as in PyTorch). Returns (b, d, n)."""
    b, n, s, d = x.shape
    B, S, C = b * n, s, d
    inner = heads * dim_head
    Cp = _round_up(C, LANE)
    G = _choose_group_block(B, cap=max_groups_per_step)

    w1, b1, w2, b2, wqkv, wout, bout, wffn, bffn = params

    # Zero-pad channels to Cp (lane-dense activations/stores); cast matmul
    # weights to bf16 (f32 MXU accumulation happens inside the kernel).
    def pad_w(w, rows, cols):
        return jnp.pad(w, ((0, rows - w.shape[0]),
                           (0, cols - w.shape[1]))).astype(jnp.bfloat16)

    def pad_b(v):
        return jnp.pad(v, ((0, 0), (0, Cp - v.shape[1]))).astype(jnp.float32)

    w1p, w2p, wffnp = (pad_w(w, Cp, Cp) for w in (w1, w2, wffn))
    wqkvp = pad_w(wqkv, Cp, 3 * inner)
    woutp = pad_w(wout, inner, Cp)
    b1p, b2p, boutp, bffnp = (pad_b(v) for v in (b1, b2, bout, bffn))

    # PyTorch: permute(0,1,3,2).reshape(-1,d,s) gives NCL groups; its channel-
    # last transpose is exactly x.reshape(B, s, d). Pad channels with zeros.
    xk = jnp.pad(x.reshape(B, S, C).astype(jnp.float32),
                 ((0, 0), (0, 0), (0, Cp - C))).astype(jnp.bfloat16)

    def full(shape):
        nd = len(shape)
        return pl.BlockSpec(shape, lambda i, _nd=nd: (0,) * _nd)

    in_specs = [
        pl.BlockSpec((G, S, Cp), lambda i: (i, 0, 0)),
        full((Cp, Cp)), full((1, Cp)),
        full((Cp, Cp)), full((1, Cp)),
        full((Cp, 3 * inner)),
        full((inner, Cp)), full((1, Cp)),
        full((Cp, Cp)), full((1, Cp)),
    ]
    out_spec = pl.BlockSpec((1, G, Cp), lambda i: (i, 0, 0))

    # Advisory cost estimate for XLA scheduling around the custom call.
    flops = int(2 * B * S * (3 * Cp * Cp + Cp * 3 * inner + inner * Cp)
                + 4 * B * heads * S * S * dim_head)
    bytes_accessed = int(
        xk.size * 2 + (B // G) * G * Cp * 4
        + sum(int(a.size) * 2 for a in (w1p, w2p, wffnp, wqkvp, woutp))
        + sum(int(a.size) * 4 for a in (b1p, b2p, boutp, bffnp)))
    ce = pl.CostEstimate(flops=flops, transcendentals=int(B * heads * S * S),
                         bytes_accessed=bytes_accessed)

    kernel = functools.partial(_pre_extraction_kernel,
                               heads=heads, dim_head=dim_head)
    pooled = pl.pallas_call(
        kernel,
        out_shape=jax.ShapeDtypeStruct((B // G, G, Cp), jnp.float32),
        grid_spec=pltpu.PrefetchScalarGridSpec(
            num_scalar_prefetch=0,
            grid=(B // G,),
            in_specs=in_specs,
            out_specs=out_spec,
        ),
        compiler_params=pltpu.CompilerParams(
            dimension_semantics=("parallel",)),
        cost_estimate=ce,
    )(xk, w1p, b1p, w2p, b2p, wqkvp, woutp, boutp, wffnp, bffnp)

    pooled = pooled.reshape(B, Cp)[:, :C]                  # drop channel padding
    return pooled.reshape(b, n, C).transpose(0, 2, 1)      # (b, d, n)


# --------------------- deterministic parameter setup -----------------------
def _fold_conv_bn(w, conv_bias, gamma, beta, mean, var, eps=BN_EPS):
    """Fold eval-mode BatchNorm into a k=1 conv. w: (Cout, Cin)."""
    sc = gamma / jnp.sqrt(var + eps)
    w_f = w * sc[:, None]
    cb = conv_bias if conv_bias is not None else jnp.zeros_like(mean)
    b_f = sc * (cb - mean) + beta
    return w_f.T.astype(jnp.float32), b_f[None, :].astype(jnp.float32)


def make_params(key, channels, heads=HEADS, dim_head=DIM_HEAD):
    C, inner = channels, heads * dim_head
    ks = list(jax.random.split(key, 24))

    def bn(k):
        k1, k2, k3, k4 = jax.random.split(k, 4)
        gamma = 1.0 + 0.1 * jax.random.normal(k1, (C,))
        beta = 0.1 * jax.random.normal(k2, (C,))
        mean = 0.1 * jax.random.normal(k3, (C,))
        var = 1.0 + 0.1 * jnp.abs(jax.random.normal(k4, (C,)))
        return gamma, beta, mean, var

    # FCBNReLU1DRes
    conv1_w = jax.random.normal(ks[0], (C, C)) * (1.0 / C ** 0.5)
    conv2_w = jax.random.normal(ks[1], (C, C)) * (1.0 / C ** 0.5)
    w1, b1 = _fold_conv_bn(conv1_w, None, *bn(ks[2]))
    w2, b2 = _fold_conv_bn(conv2_w, None, *bn(ks[3]))

    # Attention
    wqkv = (jax.random.normal(ks[4], (3 * inner, C)) * (1.0 / C ** 0.5)).T
    wqkv = wqkv.astype(jnp.float32)                        # (C, 3*inner)
    to_out_w = jax.random.normal(ks[5], (C, inner)) * (1.0 / inner ** 0.5)
    to_out_b = 0.1 * jax.random.normal(ks[6], (C,))
    wout, bout = _fold_conv_bn(to_out_w, to_out_b, *bn(ks[7]))   # (inner, C)

    # FFN
    ffn_w = jax.random.normal(ks[8], (C, C)) * (1.0 / C ** 0.5)
    wffn, bffn = _fold_conv_bn(ffn_w, None, *bn(ks[9]))

    return (w1, b1, w2, b2, wqkv, wout, bout, wffn, bffn)


# ----------------------------- pure-JAX reference ---------------------------
def reference_forward(x, params, *, heads=HEADS, dim_head=DIM_HEAD):
    b, n, s, d = x.shape
    B, inner = b * n, heads * dim_head
    xg = x.reshape(B, s, d).astype(jnp.float32)
    w1, b1, w2, b2, wqkv, wout, bout, wffn, bffn = params

    def mm(a, w):
        return jnp.einsum('bsc,cd->bsd', a, w, precision=lax.Precision.HIGHEST)

    h = jax.nn.relu(mm(xg, w1) + b1)
    x1 = jax.nn.relu(mm(h, w2) + b2 + xg)

    qkv = mm(x1, wqkv)
    q, k, v = qkv[..., :inner], qkv[..., inner:2 * inner], qkv[..., 2 * inner:]

    def split(t):
        return t.reshape(B, s, heads, dim_head).transpose(0, 2, 1, 3)

    q, k, v = split(q), split(k), split(v)
    dots = jnp.einsum('bhid,bhjd->bhij', q, k,
                      precision=lax.Precision.HIGHEST) * dim_head ** -0.5
    attn = jax.nn.softmax(dots, axis=-1)
    o = jnp.einsum('bhij,bhjd->bhid', attn, v, precision=lax.Precision.HIGHEST)
    o = o.transpose(0, 2, 1, 3).reshape(B, s, inner)

    att = jax.nn.relu(mm(o, wout) + bout + x1)
    out = jax.nn.relu(mm(att, wffn) + bffn + att)
    pooled = jnp.max(out, axis=1)                          # (B, d)
    return pooled.reshape(b, n, d).transpose(0, 2, 1)      # (b, d, n)


# ---------------------------------- main ------------------------------------
if __name__ == "__main__":
    b, n, s, channels = 2, 4, 16, 32                       # small shapes
    key = jax.random.PRNGKey(0)
    kx, kp = jax.random.split(key)
    x = jax.random.normal(kx, (b, n, s, channels), dtype=jnp.float32)
    params = make_params(kp, channels)

    out = jax.block_until_ready(pre_extraction_forward(x, params))
    ref = jax.block_until_ready(reference_forward(x, params))

    assert out.shape == (b, channels, n), out.shape
    # bf16 MXU inputs (f32 accumulation) + approx softmax reciprocal give
    # ~1e-2-level deviations vs. the f32 HIGHEST-precision reference.
    err = float(jnp.max(jnp.abs(out - ref)))
    assert jnp.allclose(out, ref, atol=3e-2, rtol=3e-2), err

    print("KERNEL_OK")
</pallas_src>

<mosaic_0001>
module attributes {stable_mosaic.version = 11 : i64} {
  func.func @_pre_extraction_kernel(%arg0: i32, %arg1: memref<4x16x128xbf16, #tpu.memory_space<vmem>>, %arg2: memref<128x128xbf16, #tpu.memory_space<vmem>>, %arg3: memref<1x128xf32, #tpu.memory_space<vmem>>, %arg4: memref<128x128xbf16, #tpu.memory_space<vmem>>, %arg5: memref<1x128xf32, #tpu.memory_space<vmem>>, %arg6: memref<128x384xbf16, #tpu.memory_space<vmem>>, %arg7: memref<128x128xbf16, #tpu.memory_space<vmem>>, %arg8: memref<1x128xf32, #tpu.memory_space<vmem>>, %arg9: memref<128x128xbf16, #tpu.memory_space<vmem>>, %arg10: memref<1x128xf32, #tpu.memory_space<vmem>>, %arg11: memref<1x4x128xf32, #tpu.memory_space<vmem>>) attributes {dimension_semantics = [#tpu.dimension_semantics<parallel>], iteration_bounds = array<i64: 2>, scalar_prefetch = 0 : i64, scratch_operands = 0 : i64, tpu.core_type = #tpu.core_type<tc>, window_params = [{transform_indices = @transform_0, window_bounds = array<i64: 4, 16, 128>}, {pipeline_mode = #tpu.pipeline_mode<synchronous>, transform_indices = @transform_1, window_bounds = array<i64: 128, 128>}, {pipeline_mode = #tpu.pipeline_mode<synchronous>, transform_indices = @transform_2, window_bounds = array<i64: 1, 128>}, {pipeline_mode = #tpu.pipeline_mode<synchronous>, transform_indices = @transform_3, window_bounds = array<i64: 128, 128>}, {pipeline_mode = #tpu.pipeline_mode<synchronous>, transform_indices = @transform_4, window_bounds = array<i64: 1, 128>}, {pipeline_mode = #tpu.pipeline_mode<synchronous>, transform_indices = @transform_5, window_bounds = array<i64: 128, 384>}, {pipeline_mode = #tpu.pipeline_mode<synchronous>, transform_indices = @transform_6, window_bounds = array<i64: 128, 128>}, {pipeline_mode = #tpu.pipeline_mode<synchronous>, transform_indices = @transform_7, window_bounds = array<i64: 1, 128>}, {pipeline_mode = #tpu.pipeline_mode<synchronous>, transform_indices = @transform_8, window_bounds = array<i64: 128, 128>}, {pipeline_mode = #tpu.pipeline_mode<synchronous>, transform_indices = @transform_9, window_bounds = array<i64: 1, 128>}, {transform_indices = @transform_10, window_bounds = array<i64: 1, 4, 128>}]} {
    %c0 = arith.constant 0 : index
    %c0_0 = arith.constant 0 : index
    %c0_1 = arith.constant 0 : index
    %0 = vector.load %arg1[%c0, %c0_0, %c0_1] : memref<4x16x128xbf16, #tpu.memory_space<vmem>>, vector<4x16x128xbf16>
    %1 = arith.extf %0 : vector<4x16x128xbf16> to vector<4x16x128xf32>
    %2 = vector.shape_cast %1 : vector<4x16x128xf32> to vector<64x128xf32>
    %3 = arith.truncf %2 : vector<64x128xf32> to vector<64x128xbf16>
    %c0_2 = arith.constant 0 : index
    %c0_3 = arith.constant 0 : index
    %4 = vector.load %arg2[%c0_2, %c0_3] : memref<128x128xbf16, #tpu.memory_space<vmem>>, vector<128x128xbf16>
    %cst = arith.constant dense<0.000000e+00> : vector<64x128xf32>
    %5 = tpu.matmul %3, %4, %cst {dimension_numbers = #tpu.dot_dimension_numbers<[1], [0], [0], [1], [0, 0, 1, 1], [], []>} : vector<64x128xbf16>, vector<128x128xbf16>, vector<64x128xf32> -> vector<64x128xf32>
    %c0_4 = arith.constant 0 : index
    %c0_5 = arith.constant 0 : index
    %6 = vector.load %arg3[%c0_4, %c0_5] : memref<1x128xf32, #tpu.memory_space<vmem>>, vector<1x128xf32>
    %7 = vector.broadcast %6 : vector<1x128xf32> to vector<64x128xf32>
    %8 = arith.addf %5, %7 : vector<64x128xf32>
    %cst_6 = arith.constant 0.000000e+00 : f32
    %9 = vector.broadcast %cst_6 : f32 to vector<64x128xf32>
    %10 = arith.maximumf %8, %9 : vector<64x128xf32>
    %11 = arith.truncf %10 : vector<64x128xf32> to vector<64x128xbf16>
    %c0_7 = arith.constant 0 : index
    %c0_8 = arith.constant 0 : index
    %12 = vector.load %arg4[%c0_7, %c0_8] : memref<128x128xbf16, #tpu.memory_space<vmem>>, vector<128x128xbf16>
    %cst_9 = arith.constant dense<0.000000e+00> : vector<64x128xf32>
    %13 = tpu.matmul %11, %12, %cst_9 {dimension_numbers = #tpu.dot_dimension_numbers<[1], [0], [0], [1], [0, 0, 1, 1], [], []>} : vector<64x128xbf16>, vector<128x128xbf16>, vector<64x128xf32> -> vector<64x128xf32>
    %c0_10 = arith.constant 0 : index
    %c0_11 = arith.constant 0 : index
    %14 = vector.load %arg5[%c0_10, %c0_11] : memref<1x128xf32, #tpu.memory_space<vmem>>, vector<1x128xf32>
    %15 = vector.broadcast %14 : vector<1x128xf32> to vector<64x128xf32>
    %16 = arith.addf %13, %15 : vector<64x128xf32>
    %17 = arith.addf %16, %2 : vector<64x128xf32>
    %cst_12 = arith.constant 0.000000e+00 : f32
    %18 = vector.broadcast %cst_12 : f32 to vector<64x128xf32>
    %19 = arith.maximumf %17, %18 : vector<64x128xf32>
    %20 = arith.truncf %19 : vector<64x128xf32> to vector<64x128xbf16>
    %c0_13 = arith.constant 0 : index
    %c0_14 = arith.constant 0 : index
    %21 = vector.load %arg6[%c0_13, %c0_14] : memref<128x384xbf16, #tpu.memory_space<vmem>>, vector<128x384xbf16>
    %cst_15 = arith.constant dense<0.000000e+00> : vector<64x384xf32>
    %22 = tpu.matmul %20, %21, %cst_15 {dimension_numbers = #tpu.dot_dimension_numbers<[1], [0], [0], [1], [0, 0, 1, 1], [], []>} : vector<64x128xbf16>, vector<128x384xbf16>, vector<64x384xf32> -> vector<64x384xf32>
    %23 = vector.shape_cast %22 : vector<64x384xf32> to vector<4x16x384xf32>
    %24 = vector.extract_strided_slice %23 {offsets = [0, 0, 0], sizes = [4, 16, 32], strides = [1, 1, 1]} : vector<4x16x384xf32> to vector<4x16x32xf32>
    %25 = arith.truncf %24 : vector<4x16x32xf32> to vector<4x16x32xbf16>
    %26 = vector.extract_strided_slice %23 {offsets = [0, 0, 128], sizes = [4, 16, 32], strides = [1, 1, 1]} : vector<4x16x384xf32> to vector<4x16x32xf32>
    %27 = arith.truncf %26 : vector<4x16x32xf32> to vector<4x16x32xbf16>
    %28 = vector.extract_strided_slice %23 {offsets = [0, 0, 256], sizes = [4, 16, 32], strides = [1, 1, 1]} : vector<4x16x384xf32> to vector<4x16x32xf32>
    %29 = arith.truncf %28 : vector<4x16x32xf32> to vector<4x16x32xbf16>
    "tpu.trace_start"() <{level = 10 : i32, message = "gid,gjd->gij"}> : () -> ()
    %cst_16 = arith.constant dense<0.000000e+00> : vector<4x16x16xf32>
    %30 = tpu.matmul %25, %27, %cst_16 {dimension_numbers = #tpu.dot_dimension_numbers<[2], [2], [1], [1], [0, 0, 0, 1, 1, 1], [0], [0]>} : vector<4x16x32xbf16>, vector<4x16x32xbf16>, vector<4x16x16xf32> -> vector<4x16x16xf32>
    "tpu.trace_stop"() : () -> ()
    %cst_17 = arith.constant 0.176776692 : f32
    %31 = vector.broadcast %cst_17 : f32 to vector<4x16x16xf32>
    %32 = arith.mulf %30, %31 : vector<4x16x16xf32>
    %cst_18 = arith.constant dense<0xFF800000> : vector<4x16xf32>
    %33 = vector.multi_reduction <maximumf>, %32, %cst_18 [2] : vector<4x16x16xf32> to vector<4x16xf32>
    %34 = vector.shape_cast %33 : vector<4x16xf32> to vector<4x16x1xf32>
    %35 = vector.broadcast %34 : vector<4x16x1xf32> to vector<4x16x16xf32>
    %36 = arith.subf %32, %35 : vector<4x16x16xf32>
    %37 = math.exp %36 : vector<4x16x16xf32>
    %cst_19 = arith.constant dense<0.000000e+00> : vector<4x16xf32>
    %38 = vector.multi_reduction <add>, %37, %cst_19 [2] : vector<4x16x16xf32> to vector<4x16xf32>
    %39 = vector.shape_cast %38 : vector<4x16xf32> to vector<4x16x1xf32>
    %40 = tpu.reciprocal %39 {approx = true} : vector<4x16x1xf32> -> vector<4x16x1xf32>
    %41 = vector.broadcast %40 : vector<4x16x1xf32> to vector<4x16x16xf32>
    %42 = arith.mulf %37, %41 : vector<4x16x16xf32>
    %43 = arith.truncf %42 : vector<4x16x16xf32> to vector<4x16x16xbf16>
    "tpu.trace_start"() <{level = 10 : i32, message = "gij,gjd->gid"}> : () -> ()
    %cst_20 = arith.constant dense<0.000000e+00> : vector<4x16x32xf32>
    %44 = tpu.matmul %43, %29, %cst_20 {dimension_numbers = #tpu.dot_dimension_numbers<[2], [1], [1], [2], [0, 0, 0, 1, 1, 2], [0], [0]>} : vector<4x16x16xbf16>, vector<4x16x32xbf16>, vector<4x16x32xf32> -> vector<4x16x32xf32>
    "tpu.trace_stop"() : () -> ()
    %45 = vector.extract_strided_slice %23 {offsets = [0, 0, 32], sizes = [4, 16, 32], strides = [1, 1, 1]} : vector<4x16x384xf32> to vector<4x16x32xf32>
    %46 = arith.truncf %45 : vector<4x16x32xf32> to vector<4x16x32xbf16>
    %47 = vector.extract_strided_slice %23 {offsets = [0, 0, 160], sizes = [4, 16, 32], strides = [1, 1, 1]} : vector<4x16x384xf32> to vector<4x16x32xf32>
    %48 = arith.truncf %47 : vector<4x16x32xf32> to vector<4x16x32xbf16>
    %49 = vector.extract_strided_slice %23 {offsets = [0, 0, 288], sizes = [4, 16, 32], strides = [1, 1, 1]} : vector<4x16x384xf32> to vector<4x16x32xf32>
    %50 = arith.truncf %49 : vector<4x16x32xf32> to vector<4x16x32xbf16>
    "tpu.trace_start"() <{level = 10 : i32, message = "gid,gjd->gij"}> : () -> ()
    %cst_21 = arith.constant dense<0.000000e+00> : vector<4x16x16xf32>
    %51 = tpu.matmul %46, %48, %cst_21 {dimension_numbers = #tpu.dot_dimension_numbers<[2], [2], [1], [1], [0, 0, 0, 1, 1, 1], [0], [0]>} : vector<4x16x32xbf16>, vector<4x16x32xbf16>, vector<4x16x16xf32> -> vector<4x16x16xf32>
    "tpu.trace_stop"() : () -> ()
    %cst_22 = arith.constant 0.176776692 : f32
    %52 = vector.broadcast %cst_22 : f32 to vector<4x16x16xf32>
    %53 = arith.mulf %51, %52 : vector<4x16x16xf32>
    %cst_23 = arith.constant dense<0xFF800000> : vector<4x16xf32>
    %54 = vector.multi_reduction <maximumf>, %53, %cst_23 [2] : vector<4x16x16xf32> to vector<4x16xf32>
    %55 = vector.shape_cast %54 : vector<4x16xf32> to vector<4x16x1xf32>
    %56 = vector.broadcast %55 : vector<4x16x1xf32> to vector<4x16x16xf32>
    %57 = arith.subf %53, %56 : vector<4x16x16xf32>
    %58 = math.exp %57 : vector<4x16x16xf32>
    %cst_24 = arith.constant dense<0.000000e+00> : vector<4x16xf32>
    %59 = vector.multi_reduction <add>, %58, %cst_24 [2] : vector<4x16x16xf32> to vector<4x16xf32>
    %60 = vector.shape_cast %59 : vector<4x16xf32> to vector<4x16x1xf32>
    %61 = tpu.reciprocal %60 {approx = true} : vector<4x16x1xf32> -> vector<4x16x1xf32>
    %62 = vector.broadcast %61 : vector<4x16x1xf32> to vector<4x16x16xf32>
    %63 = arith.mulf %58, %62 : vector<4x16x16xf32>
    %64 = arith.truncf %63 : vector<4x16x16xf32> to vector<4x16x16xbf16>
    "tpu.trace_start"() <{level = 10 : i32, message = "gij,gjd->gid"}> : () -> ()
    %cst_25 = arith.constant dense<0.000000e+00> : vector<4x16x32xf32>
    %65 = tpu.matmul %64, %50, %cst_25 {dimension_numbers = #tpu.dot_dimension_numbers<[2], [1], [1], [2], [0, 0, 0, 1, 1, 2], [0], [0]>} : vector<4x16x16xbf16>, vector<4x16x32xbf16>, vector<4x16x32xf32> -> vector<4x16x32xf32>
    "tpu.trace_stop"() : () -> ()
    %66 = vector.extract_strided_slice %23 {offsets = [0, 0, 64], sizes = [4, 16, 32], strides = [1, 1, 1]} : vector<4x16x384xf32> to vector<4x16x32xf32>
    %67 = arith.truncf %66 : vector<4x16x32xf32> to vector<4x16x32xbf16>
    %68 = vector.extract_strided_slice %23 {offsets = [0, 0, 192], sizes = [4, 16, 32], strides = [1, 1, 1]} : vector<4x16x384xf32> to vector<4x16x32xf32>
    %69 = arith.truncf %68 : vector<4x16x32xf32> to vector<4x16x32xbf16>
    %70 = vector.extract_strided_slice %23 {offsets = [0, 0, 320], sizes = [4, 16, 32], strides = [1, 1, 1]} : vector<4x16x384xf32> to vector<4x16x32xf32>
    %71 = arith.truncf %70 : vector<4x16x32xf32> to vector<4x16x32xbf16>
    "tpu.trace_start"() <{level = 10 : i32, message = "gid,gjd->gij"}> : () -> ()
    %cst_26 = arith.constant dense<0.000000e+00> : vector<4x16x16xf32>
    %72 = tpu.matmul %67, %69, %cst_26 {dimension_numbers = #tpu.dot_dimension_numbers<[2], [2], [1], [1], [0, 0, 0, 1, 1, 1], [0], [0]>} : vector<4x16x32xbf16>, vector<4x16x32xbf16>, vector<4x16x16xf32> -> vector<4x16x16xf32>
    "tpu.trace_stop"() : () -> ()
    %cst_27 = arith.constant 0.176776692 : f32
    %73 = vector.broadcast %cst_27 : f32 to vector<4x16x16xf32>
    %74 = arith.mulf %72, %73 : vector<4x16x16xf32>
    %cst_28 = arith.constant dense<0xFF800000> : vector<4x16xf32>
    %75 = vector.multi_reduction <maximumf>, %74, %cst_28 [2] : vector<4x16x16xf32> to vector<4x16xf32>
    %76 = vector.shape_cast %75 : vector<4x16xf32> to vector<4x16x1xf32>
    %77 = vector.broadcast %76 : vector<4x16x1xf32> to vector<4x16x16xf32>
    %78 = arith.subf %74, %77 : vector<4x16x16xf32>
    %79 = math.exp %78 : vector<4x16x16xf32>
    %cst_29 = arith.constant dense<0.000000e+00> : vector<4x16xf32>
    %80 = vector.multi_reduction <add>, %79, %cst_29 [2] : vector<4x16x16xf32> to vector<4x16xf32>
    %81 = vector.shape_cast %80 : vector<4x16xf32> to vector<4x16x1xf32>
    %82 = tpu.reciprocal %81 {approx = true} : vector<4x16x1xf32> -> vector<4x16x1xf32>
    %83 = vector.broadcast %82 : vector<4x16x1xf32> to vector<4x16x16xf32>
    %84 = arith.mulf %79, %83 : vector<4x16x16xf32>
    %85 = arith.truncf %84 : vector<4x16x16xf32> to vector<4x16x16xbf16>
    "tpu.trace_start"() <{level = 10 : i32, message = "gij,gjd->gid"}> : () -> ()
    %cst_30 = arith.constant dense<0.000000e+00> : vector<4x16x32xf32>
    %86 = tpu.matmul %85, %71, %cst_30 {dimension_numbers = #tpu.dot_dimension_numbers<[2], [1], [1], [2], [0, 0, 0, 1, 1, 2], [0], [0]>} : vector<4x16x16xbf16>, vector<4x16x32xbf16>, vector<4x16x32xf32> -> vector<4x16x32xf32>
    "tpu.trace_stop"() : () -> ()
    %87 = vector.extract_strided_slice %23 {offsets = [0, 0, 96], sizes = [4, 16, 32], strides = [1, 1, 1]} : vector<4x16x384xf32> to vector<4x16x32xf32>
    %88 = arith.truncf %87 : vector<4x16x32xf32> to vector<4x16x32xbf16>
    %89 = vector.extract_strided_slice %23 {offsets = [0, 0, 224], sizes = [4, 16, 32], strides = [1, 1, 1]} : vector<4x16x384xf32> to vector<4x16x32xf32>
    %90 = arith.truncf %89 : vector<4x16x32xf32> to vector<4x16x32xbf16>
    %91 = vector.extract_strided_slice %23 {offsets = [0, 0, 352], sizes = [4, 16, 32], strides = [1, 1, 1]} : vector<4x16x384xf32> to vector<4x16x32xf32>
    %92 = arith.truncf %91 : vector<4x16x32xf32> to vector<4x16x32xbf16>
    "tpu.trace_start"() <{level = 10 : i32, message = "gid,gjd->gij"}> : () -> ()
    %cst_31 = arith.constant dense<0.000000e+00> : vector<4x16x16xf32>
    %93 = tpu.matmul %88, %90, %cst_31 {dimension_numbers = #tpu.dot_dimension_numbers<[2], [2], [1], [1], [0, 0, 0, 1, 1, 1], [0], [0]>} : vector<4x16x32xbf16>, vector<4x16x32xbf16>, vector<4x16x16xf32> -> vector<4x16x16xf32>
    "tpu.trace_stop"() : () -> ()
    %cst_32 = arith.constant 0.176776692 : f32
    %94 = vector.broadcast %cst_32 : f32 to vector<4x16x16xf32>
    %95 = arith.mulf %93, %94 : vector<4x16x16xf32>
    %cst_33 = arith.constant dense<0xFF800000> : vector<4x16xf32>
    %96 = vector.multi_reduction <maximumf>, %95, %cst_33 [2] : vector<4x16x16xf32> to vector<4x16xf32>
    %97 = vector.shape_cast %96 : vector<4x16xf32> to vector<4x16x1xf32>
    %98 = vector.broadcast %97 : vector<4x16x1xf32> to vector<4x16x16xf32>
    %99 = arith.subf %95, %98 : vector<4x16x16xf32>
    %100 = math.exp %99 : vector<4x16x16xf32>
    %cst_34 = arith.constant dense<0.000000e+00> : vector<4x16xf32>
    %101 = vector.multi_reduction <add>, %100, %cst_34 [2] : vector<4x16x16xf32> to vector<4x16xf32>
    %102 = vector.shape_cast %101 : vector<4x16xf32> to vector<4x16x1xf32>
    %103 = tpu.reciprocal %102 {approx = true} : vector<4x16x1xf32> -> vector<4x16x1xf32>
    %104 = vector.broadcast %103 : vector<4x16x1xf32> to vector<4x16x16xf32>
    %105 = arith.mulf %100, %104 : vector<4x16x16xf32>
    %106 = arith.truncf %105 : vector<4x16x16xf32> to vector<4x16x16xbf16>
    "tpu.trace_start"() <{level = 10 : i32, message = "gij,gjd->gid"}> : () -> ()
    %cst_35 = arith.constant dense<0.000000e+00> : vector<4x16x32xf32>
    %107 = tpu.matmul %106, %92, %cst_35 {dimension_numbers = #tpu.dot_dimension_numbers<[2], [1], [1], [2], [0, 0, 0, 1, 1, 2], [0], [0]>} : vector<4x16x16xbf16>, vector<4x16x32xbf16>, vector<4x16x32xf32> -> vector<4x16x32xf32>
    "tpu.trace_stop"() : () -> ()
    %108 = tpu.concatenate %44, %65, %86, %107 in 2 : vector<4x16x32xf32>, vector<4x16x32xf32>, vector<4x16x32xf32>, vector<4x16x32xf32> -> vector<4x16x128xf32>
    %109 = vector.shape_cast %108 : vector<4x16x128xf32> to vector<64x128xf32>
    %110 = arith.truncf %109 : vector<64x128xf32> to vector<64x128xbf16>
    %c0_36 = arith.constant 0 : index
    %c0_37 = arith.constant 0 : index
    %111 = vector.load %arg7[%c0_36, %c0_37] : memref<128x128xbf16, #tpu.memory_space<vmem>>, vector<128x128xbf16>
    %cst_38 = arith.constant dense<0.000000e+00> : vector<64x128xf32>
    %112 = tpu.matmul %110, %111, %cst_38 {dimension_numbers = #tpu.dot_dimension_numbers<[1], [0], [0], [1], [0, 0, 1, 1], [], []>} : vector<64x128xbf16>, vector<128x128xbf16>, vector<64x128xf32> -> vector<64x128xf32>
    %c0_39 = arith.constant 0 : index
    %c0_40 = arith.constant 0 : index
    %113 = vector.load %arg8[%c0_39, %c0_40] : memref<1x128xf32, #tpu.memory_space<vmem>>, vector<1x128xf32>
    %114 = vector.broadcast %113 : vector<1x128xf32> to vector<64x128xf32>
    %115 = arith.addf %112, %114 : vector<64x128xf32>
    %116 = arith.addf %115, %19 : vector<64x128xf32>
    %cst_41 = arith.constant 0.000000e+00 : f32
    %117 = vector.broadcast %cst_41 : f32 to vector<64x128xf32>
    %118 = arith.maximumf %116, %117 : vector<64x128xf32>
    %119 = arith.truncf %118 : vector<64x128xf32> to vector<64x128xbf16>
    %c0_42 = arith.constant 0 : index
    %c0_43 = arith.constant 0 : index
    %120 = vector.load %arg9[%c0_42, %c0_43] : memref<128x128xbf16, #tpu.memory_space<vmem>>, vector<128x128xbf16>
    %cst_44 = arith.constant dense<0.000000e+00> : vector<64x128xf32>
    %121 = tpu.matmul %119, %120, %cst_44 {dimension_numbers = #tpu.dot_dimension_numbers<[1], [0], [0], [1], [0, 0, 1, 1], [], []>} : vector<64x128xbf16>, vector<128x128xbf16>, vector<64x128xf32> -> vector<64x128xf32>
    %c0_45 = arith.constant 0 : index
    %c0_46 = arith.constant 0 : index
    %122 = vector.load %arg10[%c0_45, %c0_46] : memref<1x128xf32, #tpu.memory_space<vmem>>, vector<1x128xf32>
    %123 = vector.broadcast %122 : vector<1x128xf32> to vector<64x128xf32>
    %124 = arith.addf %121, %123 : vector<64x128xf32>
    %125 = arith.addf %118, %124 : vector<64x128xf32>
    %cst_47 = arith.constant 0.000000e+00 : f32
    %126 = vector.broadcast %cst_47 : f32 to vector<64x128xf32>
    %127 = arith.maximumf %125, %126 : vector<64x128xf32>
    %128 = vector.shape_cast %127 : vector<64x128xf32> to vector<4x16x128xf32>
    %cst_48 = arith.constant dense<0xFF800000> : vector<4x128xf32>
    %129 = vector.multi_reduction <maximumf>, %128, %cst_48 [1] : vector<4x16x128xf32> to vector<4x128xf32>
    %c0_49 = arith.constant 0 : index
    %c0_50 = arith.constant 0 : index
    %c0_51 = arith.constant 0 : index
    %130 = vector.load %arg11[%c0_49, %c0_50, %c0_51] : memref<1x4x128xf32, #tpu.memory_space<vmem>>, vector<1x4x128xf32>
    %131 = vector.shape_cast %130 : vector<1x4x128xf32> to vector<4x128xf32>
    %132 = vector.shape_cast %129 : vector<4x128xf32> to vector<1x4x128xf32>
    tpu.vector_store %arg11[%c0_49, %c0_50, %c0_51], %132 {strides = array<i32>} : memref<1x4x128xf32, #tpu.memory_space<vmem>>, vector<1x4x128xf32>,
    return
  }
  func.func @transform_0(%arg0: i32) -> (i32, i32, i32) {
    %c0_i32 = arith.constant 0 : i32
    %c0_i32_0 = arith.constant 0 : i32
    %c0_i32_1 = arith.constant 0 : i32
    return %arg0, %c0_i32, %c0_i32_0 : i32, i32, i32
  }
  func.func @transform_1(%arg0: i32) -> (i32, i32) {
    %c0_i32 = arith.constant 0 : i32
    %c0_i32_0 = arith.constant 0 : i32
    %c0_i32_1 = arith.constant 0 : i32
    return %c0_i32, %c0_i32_0 : i32, i32
  }
  func.func @transform_2(%arg0: i32) -> (i32, i32) {
    %c0_i32 = arith.constant 0 : i32
    %c0_i32_0 = arith.constant 0 : i32
    %c0_i32_1 = arith.constant 0 : i32
    return %c0_i32, %c0_i32_0 : i32, i32
  }
  func.func @transform_3(%arg0: i32) -> (i32, i32) {
    %c0_i32 = arith.constant 0 : i32
    %c0_i32_0 = arith.constant 0 : i32
    %c0_i32_1 = arith.constant 0 : i32
    return %c0_i32, %c0_i32_0 : i32, i32
  }
  func.func @transform_4(%arg0: i32) -> (i32, i32) {
    %c0_i32 = arith.constant 0 : i32
    %c0_i32_0 = arith.constant 0 : i32
    %c0_i32_1 = arith.constant 0 : i32
    return %c0_i32, %c0_i32_0 : i32, i32
  }
  func.func @transform_5(%arg0: i32) -> (i32, i32) {
    %c0_i32 = arith.constant 0 : i32
    %c0_i32_0 = arith.constant 0 : i32
    %c0_i32_1 = arith.constant 0 : i32
    return %c0_i32, %c0_i32_0 : i32, i32
  }
  func.func @transform_6(%arg0: i32) -> (i32, i32) {
    %c0_i32 = arith.constant 0 : i32
    %c0_i32_0 = arith.constant 0 : i32
    %c0_i32_1 = arith.constant 0 : i32
    return %c0_i32, %c0_i32_0 : i32, i32
  }
  func.func @transform_7(%arg0: i32) -> (i32, i32) {
    %c0_i32 = arith.constant 0 : i32
    %c0_i32_0 = arith.constant 0 : i32
    %c0_i32_1 = arith.constant 0 : i32
    return %c0_i32, %c0_i32_0 : i32, i32
  }
  func.func @transform_8(%arg0: i32) -> (i32, i32) {
    %c0_i32 = arith.constant 0 : i32
    %c0_i32_0 = arith.constant 0 : i32
    %c0_i32_1 = arith.constant 0 : i32
    return %c0_i32, %c0_i32_0 : i32, i32
  }
  func.func @transform_9(%arg0: i32) -> (i32, i32) {
    %c0_i32 = arith.constant 0 : i32
    %c0_i32_0 = arith.constant 0 : i32
    %c0_i32_1 = arith.constant 0 : i32
    return %c0_i32, %c0_i32_0 : i32, i32
  }
  func.func @transform_10(%arg0: i32) -> (i32, i32, i32) {
    %c0_i32 = arith.constant 0 : i32
    %c0_i32_0 = arith.constant 0 : i32
    %c0_i32_1 = arith.constant 0 : i32
    return %arg0, %c0_i32, %c0_i32_0 : i32, i32, i32
  }
}

</mosaic_0001>

<bundles_post_ra>
// kernel: tpu_custom_call.1
= control target key start
LH: loop header
LB: loop body
LE: loop exit
PB: predicated region body
PF: predicated region fallthrough
CT: control target
= control target key end

     0   :  { %s5728_s0 = inlined_call_operand.hbm [shape: bf16[8,16,128], index: 0, kind: input, shape index: {}]   ;;  %s5729_s1 = inlined_call_operand.hbm [shape: bf16[128,128], index: 1, kind: input, shape index: {}]   ;;  %s5730_s2 = inlined_call_operand.vmem [shape: f32[1,128], index: 2, kind: input, shape index: {}]   ;;  %s5731_s3 = inlined_call_operand.hbm [shape: bf16[128,128], index: 3, kind: input, shape index: {}]   ;;  %s5732_s4 = inlined_call_operand.vmem [shape: f32[1,128], index: 4, kind: input, shape index: {}]   ;;  %s5733_s5 = inlined_call_operand.hbm [shape: bf16[128,384], index: 5, kind: input, shape index: {}]   ;;  %s5734_s6 = inlined_call_operand.hbm [shape: bf16[128,128], index: 6, kind: input, shape index: {}]   ;;  %s5735_s7 = inlined_call_operand.vmem [shape: f32[1,128], index: 7, kind: input, shape index: {}]   ;;  %s5736_s8 = inlined_call_operand.hbm [shape: bf16[128,128], index: 8, kind: input, shape index: {}]   ;;  %s5737_s9 = inlined_call_operand.vmem [shape: f32[1,128], index: 9, kind: input, shape index: {}]   ;;  %s5738_s10 = inlined_call_operand.hbm [shape: f32[2,4,128], index: 10, kind: output, shape index: {}]  }
   0x1   :  { %5755 = sst [smem:[#allocation19_spill]] %s5729_s1 }
   0x2   :  { %5756 = sst [smem:[#allocation20_spill]] %s5731_s3 }
   0x3   :  { %5757 = sst [smem:[#allocation21_spill]] %s5733_s5 }
   0x4   :  { %5758 = sst [smem:[#allocation22_spill]] %s5734_s6 }
   0x5   :  { %15 = vsyncpa [#allocation3], 0 }
   0x6   :  { %17 = vsyncpa [#allocation3 + $0x1], 0 }
   0x7   :  { %18 = vsyncpa [#allocation6], 0 }
   0x8   :  { %19 = vsyncpa [#allocation9], 0 }
   0x9   :  { %20 = vsyncpa [#allocation12], 0 }
   0xa   :  { %21 = vsyncpa [#allocation4], 0 }
   0xb   :  { %23 = vsyncpa [#allocation4 + $0x1], 0  ;;  %s4881_s13 = smov 0   ;;  %s4883_s14 = smov 0  }
   0xc   :  { %s4885_s15 = smov 0   ;;  %s4887_s16 = smov 0  }
   0xd LB: > { %s4809_s17 = smov [#allocation5]   ;;  %s4902_s19 = sadd.s32 4294967295, %s4807_s16   ;;  %s4807_s16 = sphi %s4887_s16, %s5799_s16   ;;  %s4803_s15 = sphi %s4885_s15, %s5798_s15   ;;  %s4799_s14 = sphi %s4883_s14, %s5797_s14   ;;  %s4795_s13 = sphi %s4881_s13, %s5796_s13  }
   0xe   : > { %s287_s18 = sshll.u32 %s4809_s17, 4  ;;  %p3649_p0 = scmp.ge.s32.totalorder %s4807_s16, 1  ;;  %s288_s18 = int_to_ptr.vmem [resolvable:$true] %s287_s18 }
   0xf   : > { %p5741_p1 = scmp.eq.s32.totalorder %s4902_s19, 0  ;;  %p275_p2 = scmp.lt.s32.totalorder %s4807_s16, 3 }
  0x10   : > { %s4810_s21 = smov [#allocation8]   ;;  %s4811_s24 = smov [#allocation7]  }
  0x11   : > { %p4907_p3 = pnand %p3649_p0, %p275_p2  ;;  %s319_s22 = sshll.u32 %s4810_s21, 4  ;;  %s4920_s22 = int_to_ptr.vmem [resolvable:$true] %s319_s22 }
  0x12   : > { %s4922_s25 = sshll.u32 %s4811_s24, 4  ;;  %s4584_s27 = scalar_lea.vmem %s288_s18, 1024  ;;  %s304_s25 = int_to_ptr.vmem [resolvable:$true] %s4922_s25 }
  0x13   : > { %s5759_s20 = scalar_select %p4907_p3, 1, 0 }
  0x14   : > { %p4230_p5 = pneg %p4907_p3  ;;  %p4585_p8 = scmp.ne.s32.totalorder %s288_s18, %s4584_s27 }
  0x15   : > { %p4592_p11 = scmp.lt.s32.totalorder %s288_s18, %s288_s18  ;;  %p4593_p12 = scmp.lt.s32.totalorder %s4584_s27, %s4584_s27 }
  0x16   : > { %p4916_p6 = pnand %p4230_p5, %p5741_p1 }
  0x17   : > { %p4594_p13 = por %p4593_p12, %p4592_p11 }
  0x18   : > { %p4926_p7 = pneg %p4916_p6 }
  0x1a   : > { %p4587_p9 = pnand %p4585_p8, %p4926_p7 }
  0x1c   : > { %p4588_p10 = pneg %p4587_p9 }
  0x1e   : > { %p4595_p0 = pnand %p4594_p13, %p4588_p10 }
  0x20   : > { %4598 = shalt.err (!%p4595_p0)
}
  0x21   : > { %s5739_s28 = smov 64   ;;  %s5740_s29 = smov 4  }
  0x22   : > { %s5762_s1 = sld [smem:[#allocation19_spill]]  ;;  %s4610_s12 = scalar_lea.vmem %s4920_s22, 3072 }
  0x23   : > { %p4611_p2 = scmp.ne.s32.totalorder %s4920_s22, %s4610_s12  ;;  %p4618_p9 = scmp.lt.s32.totalorder %s4920_s22, %s4920_s22 }
  0x24   : > { %p4619_p10 = scmp.lt.s32.totalorder %s4610_s12, %s4610_s12 }
  0x25   : > { %p4613_p5 = pnand %p4611_p2, %p4926_p7 }
  0x26   : > { %p4620_p11 = por %p4619_p10, %p4618_p9 }
  0x27   : > { %p4614_p8 = pneg %p4613_p5 }
  0x28   : > { %4233 = dma.hbm_to_vmem [thread:$0]  (!%p4916_p6), %s5762_s1, 1024, %s288_s18, [#allocation6], %s5739_s28, %s5739_s28, %s5740_s29  }
  0x29   : > { %p4621_p12 = pnand %p4620_p11, %p4614_p8 }
  0x2b   : > { %4624 = shalt.err (!%p4621_p12)
}
  0x2c   : > { %s4814_s17 = smov 192   ;;  %s4815_s21 = smov 12  }
  0x2d   : > { %s5763_s5 = sld [smem:[#allocation21_spill]]  ;;  %s4636_s27 = scalar_lea.vmem %s304_s25, 1024 }
  0x2e   : > { %p4637_p13 = scmp.ne.s32.totalorder %s304_s25, %s4636_s27  ;;  %p4644_p5 = scmp.lt.s32.totalorder %s304_s25, %s304_s25 }
  0x2f   : > { %p4645_p8 = scmp.lt.s32.totalorder %s4636_s27, %s4636_s27 }
  0x30   : > { %p4639_p0 = pnand %p4637_p13, %p4926_p7 }
  0x31   : > { %p4646_p9 = por %p4645_p8, %p4644_p5 }
  0x32   : > { %p4640_p2 = pneg %p4639_p0 }
  0x33   : > { %4239 = dma.hbm_to_vmem [thread:$0]  (!%p4916_p6), %s5763_s5, 3072, %s4920_s22, [#allocation9], %s4814_s17, %s4814_s17, %s4815_s21  }
  0x34   : > { %p4647_p10 = pnand %p4646_p9, %p4640_p2 }
  0x36   : > { %4650 = shalt.err (!%p4647_p10)
}
  0x37   : > { %s5764_s3 = sld [smem:[#allocation20_spill]]  ;;  %s4816_s22 = smov [#allocation10]  }
  0x38   : > { %s332_s12 = sshll.u32 %s4816_s22, 4  ;;  %s4817_s17 = smov [#allocation11]   ;;  %s333_s12 = int_to_ptr.vmem [resolvable:$true] %s332_s12 }
  0x39   : > { %s348_s21 = sshll.u32 %s4817_s17, 4  ;;  %s4662_s24 = scalar_lea.vmem %s333_s12, 1024  ;;  %s349_s21 = int_to_ptr.vmem [resolvable:$true] %s348_s21 }
  0x3a   : > { %p4663_p11 = scmp.ne.s32.totalorder %s333_s12, %s4662_s24  ;;  %p4670_p0 = scmp.lt.s32.totalorder %s333_s12, %s333_s12 }
  0x3b   : > { %p4671_p2 = scmp.lt.s32.totalorder %s4662_s24, %s4662_s24 }
  0x3c   : > { %p4665_p12 = pnand %p4663_p11, %p4926_p7 }
  0x3d   : > { %4236 = dma.hbm_to_vmem [thread:$0]  (!%p4916_p6), %s5764_s3, 1024, %s304_s25, [#allocation6], %s5739_s28, %s5739_s28, %s5740_s29  }
  0x3e   : > { %p4666_p13 = pneg %p4665_p12  ;;  %p4672_p5 = por %p4671_p2, %p4670_p0 }
  0x40   : > { %p4673_p8 = pnand %p4672_p5, %p4666_p13 }
  0x42   : > { %4676 = shalt.err (!%p4673_p8)
}
  0x43   : > { %s5765_s6 = sld [smem:[#allocation22_spill]]  ;;  %s4688_s27 = scalar_lea.vmem %s349_s21, 1024 }
  0x44   : > { %p4689_p9 = scmp.ne.s32.totalorder %s349_s21, %s4688_s27  ;;  %p4696_p12 = scmp.lt.s32.totalorder %s349_s21, %s349_s21 }
  0x45   : > { %p4697_p0 = scmp.lt.s32.totalorder %s4688_s27, %s4688_s27 }
  0x46   : > { %p4691_p10 = pnand %p4689_p9, %p4926_p7 }
  0x47   : > { %p4698_p13 = por %p4697_p0, %p4696_p12 }
  0x48   : > { %p4692_p11 = pneg %p4691_p10 }
  0x49   : > { %4242 = dma.hbm_to_vmem [thread:$0]  (!%p4916_p6), %s5765_s6, 1024, %s333_s12, [#allocation9], %s5739_s28, %s5739_s28, %s5740_s29  }
  0x4a   : > { %p4699_p2 = pnand %p4698_p13, %p4692_p11 }
  0x4c   : > { %4702 = shalt.err (!%p4699_p2)
}
  0x4d   : > { %4245 = dma.hbm_to_vmem [thread:$0]  (!%p4916_p6), %s5736_s8, 1024, %s349_s21, [#allocation12], %s5739_s28, %s5739_s28, %s5740_s29  }
  0x4e   : > { %s3648_s23 = sadd.s32 4294967294, %s4807_s16   ;;  %s4985_s26 = sadd.s32 1, %s4807_s16  }
  0x4f   : > { %s36_s22 = sadd.s32 1, %s4803_s15  ;;  %s33_s12 = ssub.s32 %s4807_s16, %s4985_s26 }
  0x50   : > { %p43_p7 = scmp.ne.s32.totalorder %s4803_s15, %s4799_s14  ;;  %p34_p5 = scmp.eq.s32.totalorder %s33_s12, 0 }
  0x51   : > { %p44_p8 = scmp.eq.s32.totalorder %s4807_s16, 0  ;;  %p49_p9 = scmp.ne.s32.totalorder %s4799_s14, %s4795_s13 }
  0x52   : > { %p262_p10 = scmp.eq.s32.totalorder %s4902_s19, 1  ;;  %p268_p0 = scmp.eq.s32.totalorder %s3648_s23, 1 }
  0x53   : > { %s4997_s17 = scalar_select %p34_p5, %s4803_s15, %s36_s22  }
  0x54   : > { %p45_p11 = por %p44_p8, %p43_p7  ;;  %p5001_p12 = por %p5741_p1, %p49_p9 }
  0x55   : > { %p5005_p6 = por %p262_p10, %p43_p7  ;;  %p4259_p13 = scmp.lt.s32.totalorder %s4807_s16, 2 }
  0x56   : > { %s5766_s24 = scalar_select %p5001_p12, 1, 0 }
  0x57   : > { %s5767_s21 = scalar_select %p5005_p6, 1, 0 }
  0x58   : > { %s365_s25 = sand.u32 1, %s4803_s15   ;;  %p5011_p2 = por %p268_p0, %p49_p9 }
  0x59   : > { %s3656_s27 = sshll.u32 %s365_s25, 5  ;;  %s3769_s30 = sshll.u32 %s4807_s16, 9 }
  0x5a   : > { %s5768_s18 = scalar_select %p5011_p2, 1, 0 }
  0x5b   : > { %s5019_s12 = scalar_lea.hbm %s5728_s0, %s3769_s30  ;;  %s369_s28 = scalar_lea.vmem [#allocation2], %s3656_s27 }
  0x5c   : > { %s377_s29 = sshll.u32 %s369_s28, 4  ;;  %p5021_p7 = pnand %p4259_p13, %p45_p11  ;;  %s5025_s29 = int_to_ptr.vmem [resolvable:$true] %s377_s29 }
  0x5d   : > { %s5027_s1 = scalar_lea.sflag [#allocation3], %s365_s25  ;;  %s4703_s3 = scalar_lea.hbm %s5019_s12, 512 }
  0x5e   : > { %p4704_p5 = scmp.ne.s32.totalorder %s5019_s12, %s4703_s3  ;;  %p4705_p8 = pneg %p5021_p7 }
  0x5f   : > { %s4708_s27 = scalar_lea.hbm %s5728_s0, 1024  ;;  %p4709_p11 = scmp.lt.s32.totalorder %s5019_s12, %s5728_s0 }
  0x60   : > { %p4706_p9 = pnand %p4705_p8, %p4704_p5  ;;  %p4710_p0 = scmp.lt.s32.totalorder %s4708_s27, %s4703_s3 }
  0x62   : > { %p4707_p10 = pneg %p4706_p9  ;;  %p4711_p13 = por %p4710_p0, %p4709_p11 }
  0x64   : > { %p4712_p4 = pnand %p4711_p13, %p4707_p10 }
  0x66   : > { %4715 = shalt.err (!%p4712_p4)
}
  0x67   : > { %s4716_s25 = scalar_lea.vmem %s5025_s29, 512  ;;  %s4818_s5 = smov [#allocation2]  }
  0x68   : > { %p4717_p1 = scmp.ne.s32.totalorder %s5025_s29, %s4716_s25  ;;  %s4721_s6 = sshll.u32 %s4818_s5, 4  ;;  %s4722_s6 = int_to_ptr.vmem [resolvable:$false] %s4721_s6 }
  0x69   : > { %s4723_s30 = scalar_lea.vmem %s4722_s6, 1024  ;;  %p4724_p9 = scmp.lt.s32.totalorder %s5025_s29, %s4722_s6 }
  0x6a   : > { %p4719_p2 = pnand %p4717_p1, %p4705_p8  ;;  %p4725_p6 = scmp.lt.s32.totalorder %s4723_s30, %s4716_s25 }
  0x6c   : > { %p4720_p5 = pneg %p4719_p2  ;;  %p4726_p12 = por %p4725_p6, %p4724_p9 }
  0x6e   : > { %p4727_p3 = pnand %p4726_p12, %p4720_p5 }
  0x70   : > { %4730 = shalt.err (!%p4727_p3)
}
  0x71   : > { %s5770_s3 = smov 4   ;;  %s5771_s11 = smov 64  }
  0x72   : > { %4249 = dma.hbm_to_vmem [thread:$0]  (!%p5021_p7), %s5019_s12, 512, %s5025_s29, %s5027_s1, %s5771_s11, %s5771_s11, %s5770_s3  }
  0x73   : > { %p5772_p1 = scmp.ne.s32.totalorder %s5759_s20, 0 }
  0x74   : > { %s5054_s5 = sand.u32 (!%p5772_p1), 1, %s4799_s14   ;;  %p5773_p3 = scmp.ne.s32.totalorder (!%p5772_p1), %s5766_s24, 0 }
  0x75   : > { %389 = sbr.rel (%p5772_p1) target bundleno = 3873 (0xf21), region = 60  ;;  %s3661_s6 = sshll.u32 (!%p5772_p1), %s5054_s5, 5 }
  0x76   : > { %s392_s27 = scalar_lea.sflag (!%p5772_p1), [#allocation3], %s5054_s5  ;;  %s5058_s28 = scalar_lea.vmem (!%p5772_p1), [#allocation2], %s3661_s6 }
  0x7a   : > { %4774 = dma.done.wait (%p5773_p3), %s392_s27, 512  }
  0x7b   : > { %4776 = vsyncadd (%p5773_p3), %s392_s27, 4294966784  ;;  %p5774_p4 = scmp.eq.s32.totalorder %s4902_s19, 0 }
  0x7d   : > { %4778 = dma.done.wait (%p5774_p4), [#allocation6], 2048   ;;  %p5775_p12 = pmov %p5774_p4 }
  0x7e   : > { %p5776_p6 = pmov %p5774_p4 }
  0x7f   : > { %4780 = vsyncadd (%p5775_p12), [#allocation6], 4294965248 }
  0x80   : > { %4782 = dma.done.wait (%p5776_p6), [#allocation9], 4096   ;;  %p5777_p2 = pmov %p5774_p4 }
  0x82   : > { %4784 = vsyncadd (%p5777_p2), [#allocation9], 4294963200  ;;  %p5778_p7 = pmov %p5777_p2 }
  0x83   : > { %p5779_p8 = pmov %p5777_p2 }
  0x84   : > { %4786 = dma.done.wait (%p5778_p7), [#allocation12], 1024  }
  0x85   : > { %4788 = vsyncadd (%p5779_p8), [#allocation12], 4294966272  ;;  %v4373_v0 = vld [vmem:[#allocation5 + $0x38] sm:$0xff]   ;;  %v4374_v1 = vld [vmem:[#allocation5 + $0x30] sm:$0xff]   ;;  %vm4821_vm0 = vmmov 0   ;;  %vm1088_vm1 = vcmask 261120  }
  0x86   : > { %3894 = vmatprep.subr.bf16.mxu0 %v4373_v0  ;;  %v4375_v2 = vld [vmem:[#allocation5 + $0x28] sm:$0xff]   ;;  %v4376_v3 = vld [vmem:[#allocation5 + $0x20] sm:$0xff]   ;;  %v4385_v5 = vld [vmem:[#allocation7 + $0x38] sm:$0xff]   ;;  %vm1285_vm2 = vcmask 130048   ;;  %s4822_s12 = smov 96   ;;  %s4823_s23 = smov 64  }
  0x87   : > { %3895 = vmatpush3.bf16.msra.mxu0 %v4373_v0  ;;  %v5077_v4 = vld [vmem:[%s5058_s28] sm:$0xff]   ;;  %v4386_v6 = vld [vmem:[#allocation7 + $0x30] sm:$0xff]   ;;  %v4377_v7 = vld [vmem:[#allocation5 + $0x18] sm:$0xff]   ;;  %3918 = vmatprep.subr.bf16.mxu1 %v4385_v5  ;;  %s4824_s22 = smov 32   ;;  %vm3146_vm3 = vcmask 523264   ;;  %vm3155_vm4 = vcmask 785408  }
  0x88   : > { %3896 = vmatprep.subr.bf16.mxu0 %v4374_v1  ;;  %3910 = vmatprep.mubr.bf16.mxu0 %v5077_v4  ;;  %v4378_v8 = vld [vmem:[#allocation5 + $0x10] sm:$0xff]   ;;  %v4387_v9 = vld [vmem:[#allocation7 + $0x28] sm:$0xff]   ;;  %v4388_v10 = vld [vmem:[#allocation7 + $0x20] sm:$0xff]   ;;  %s3667_s6 = sshll.u32 %s5054_s5, 2  ;;  %vm3508_vm5 = vcmask 1041409   ;;  %vm3510_vm6 = vcmask 1042434  }
  0x89   : > { %3919 = vmatpush3.bf16.msra.mxu1 %v4385_v5  ;;  %v4379_v11 = vld [vmem:[#allocation5 + $0x8] sm:$0xff]   ;;  %v4389_v12 = vld [vmem:[#allocation7 + $0x18] sm:$0xff]   ;;  %v4380_v13 = vld [vmem:[#allocation5] sm:$0xff]   ;;  %s3765_s27 = sshll.u32 %s4902_s19, 6  ;;  %vm3512_vm7 = vcmask 1043459   ;;  %p5793_p11 = scmp.ne.s32.totalorder %s5767_s21, 0 }
  0x8a   : > { %3920 = vmatprep.subr.bf16.mxu1 %v4386_v6  ;;  %v5081_v14 = vld [vmem:[%s5058_s28 + $0x8] sm:$0xff]   ;;  %v5084_v15 = vld [vmem:[%s5058_s28 + $0x10] sm:$0xff]   ;;  %v5087_v16 = vld [vmem:[%s5058_s28 + $0x18] sm:$0xff]   ;;  %s451_s28 = scalar_lea.vmem [#allocation13], %s3667_s6  ;;  %s5691_s24 = scalar_lea.hbm %s5738_s10, %s3765_s27 }
  0x8b   : > { %3897 = vmatpush3.bf16.msra.mxu0 %v4374_v1  ;;  %v4390_v17 = vld [vmem:[#allocation7 + $0x10] sm:$0xff]   ;;  %v4391_v18 = vld [vmem:[#allocation7 + $0x8] sm:$0xff]   ;;  %v4392_v19 = vld [vmem:[#allocation7] sm:$0xff]   ;;  %s3530_s1 = sshll.u32 %s451_s28, 4  ;;  %s4825_s19 = smov [#allocation13]   ;;  %s3531_s1 = int_to_ptr.vmem [resolvable:$true] %s3530_s1 }
  0x8c   : > { %3898 = vmatprep.subr.bf16.mxu0 %v4375_v2  ;;  %v4393_v20 = vld [vmem:[#allocation8 + $0xa8] ss:$12 sps:$4 sm:$0xff]   ;;  %v4395_v21 = vld [vmem:[#allocation8 + $0xac] ss:$12 sps:$4 sm:$0xff]   ;;  %v4396_v22 = vld [vmem:[#allocation8 + $0xb0] ss:$12 sps:$4 sm:$0xff]  }
  0x8d   : > { %3921 = vmatpush3.bf16.msra.mxu1 %v4386_v6  ;;  %v4399_v23 = vld [vmem:[#allocation8 + $0x94] ss:$12 sps:$4 sm:$0xff]   ;;  %v4397_v24 = vld [vmem:[#allocation8 + $0x90] ss:$12 sps:$4 sm:$0xff]   ;;  %v4401_v26 = vld [vmem:[#allocation8 + $0x78] ss:$12 sps:$4 sm:$0xff]  }
  0x8e   : > { %3922 = vmatprep.subr.bf16.mxu1 %v4387_v9  ;;  %v4403_v25 = vld [vmem:[#allocation8 + $0x7c] ss:$12 sps:$4 sm:$0xff]   ;;  %v4407_v27 = vld [vmem:[#allocation8 + $0x64] ss:$12 sps:$4 sm:$0xff]   ;;  %v4405_v28 = vld [vmem:[#allocation8 + $0x60] ss:$12 sps:$4 sm:$0xff]  }
  0x8f   : > { %3899 = vmatpush3.bf16.msra.mxu0 %v4375_v2  ;;  %v4411_v29 = vld [vmem:[#allocation8 + $0x4c] ss:$12 sps:$4 sm:$0xff]   ;;  %v4409_v30 = vld [vmem:[#allocation8 + $0x48] ss:$12 sps:$4 sm:$0xff]   ;;  %v3672_v33 = vld [vmem:[%s5730_s2] ss:$0 sm:$0xff] }
  0x90   : > { %3900 = vmatprep.subr.bf16.mxu0 %v4376_v3  ;;  %v4400_v51 = vld [vmem:[#allocation8 + $0x98] ss:$12 sps:$4 sm:$0xff]   ;;  %v4404_v58 = vld [vmem:[#allocation8 + $0x80] ss:$12 sps:$4 sm:$0xff]   ;;  %v4408_v62 = vld [vmem:[#allocation8 + $0x68] ss:$12 sps:$4 sm:$0xff]  }
  0x91   : > { %3923 = vmatpush3.bf16.msra.mxu1 %v4387_v9  ;;  %v4412_v63 = vld [vmem:[#allocation8 + $0x50] ss:$12 sps:$4 sm:$0xff]   ;;  %v4415_v0 = vld [vmem:[#allocation8 + $0x34] ss:$12 sps:$4 sm:$0xff]   ;;  %v4416_v2 = vld [vmem:[#allocation8 + $0x38] ss:$12 sps:$4 sm:$0xff]  }
  0x92   : > { %3924 = vmatprep.subr.bf16.mxu1 %v4388_v10  ;;  %v4413_v1 = vld [vmem:[#allocation8 + $0x30] ss:$12 sps:$4 sm:$0xff]   ;;  %v4417_v5 = vld [vmem:[#allocation8 + $0x18] ss:$12 sps:$4 sm:$0xff]   ;;  %v4420_v6 = vld [vmem:[#allocation8 + $0x20] ss:$12 sps:$4 sm:$0xff]  }
  0x93   : > { %3901 = vmatpush3.bf16.msra.mxu0 %v4376_v3  ;;  %v4419_v3 = vld [vmem:[#allocation8 + $0x1c] ss:$12 sps:$4 sm:$0xff]  }
  0x94   : > { %3902 = vmatprep.subr.bf16.mxu0 %v4377_v7  ;;  %v4424_v9 = vld [vmem:[#allocation8 + $0x8] ss:$12 sps:$4 sm:$0xff]  }
  0x95   : > { %3925 = vmatpush3.bf16.msra.mxu1 %v4388_v10  ;;  %v4819_v10 = vmov 0  }
  0x96   : > { %3926 = vmatprep.subr.bf16.mxu1 %v4389_v12 }
  0x97   : > { %3903 = vmatpush3.bf16.msra.mxu0 %v4377_v7  ;;  %v4423_v7 = vld [vmem:[#allocation8 + $0x4] ss:$12 sps:$4 sm:$0xff]  }
  0x98   : > { %3904 = vmatprep.subr.bf16.mxu0 %v4378_v8 }
  0x99   : > { %3927 = vmatpush3.bf16.msra.mxu1 %v4389_v12  ;;  %v3681_v12 = vld [vmem:[%s5732_s4] ss:$0 sm:$0xff] }
  0x9a   : > { %3928 = vmatprep.subr.bf16.mxu1 %v4390_v17 }
  0x9b   : > { %3905 = vmatpush3.bf16.msra.mxu0 %v4378_v8  ;;  %v4421_v8 = vld [vmem:[#allocation8] ss:$12 sps:$4 sm:$0xff]  }
  0x9c   : > { %3906 = vmatprep.subr.bf16.mxu0 %v4379_v11 }
  0x9d   : > { %3929 = vmatpush3.bf16.msra.mxu1 %v4390_v17  ;;  %v462_v17 = vunpack.c.l.bf16 %v5077_v4 }
  0x9e   : > { %3930 = vmatprep.subr.bf16.mxu1 %v4391_v18 }
  0x9f   : > { %3907 = vmatpush3.bf16.msra.mxu0 %v4379_v11 }
  0xa0   : > { %3908 = vmatprep.subr.bf16.mxu0 %v4380_v13 }
  0xa1   : > { %3931 = vmatpush3.bf16.msra.mxu1 %v4391_v18 }
  0xa2   : > { %3932 = vmatprep.subr.bf16.mxu1 %v4392_v19 }
  0xa3   : > { %3909 = vmatpush3.bf16.msra.mxu0 %v4380_v13 }
  0xa4   : > { %938 = vmatprep.subr.bf16.mxu0 %v4395_v21 }
  0xa5   : > { %3933 = vmatpush3.bf16.msra.mxu1 %v4392_v19  ;;  %v465_v19 = vunpack.c.h.bf16 %v5081_v14 }
  0xa6   : > { %3911 = vmatmul.mubr.bf16.vlgmr.msra.gmra.mxu0 %v5081_v14  ;;  %3942 = vmatprep.subr.bf16.mxu1 %v4396_v22 }
  0xa7   : > { %3914 = vmatprep.mubr.bf16.mxu0 %v5084_v15  ;;  %939 = vmatpush1.bf16.msra.mxu0 %v4393_v20  ;;  %v464_v20 = vunpack.c.l.bf16 %v5081_v14  ;;  %v466_v14 = vunpack.c.l.bf16 %v5084_v15 }
  0xa8   : > { %940 = vmatprep.subr.bf16.mxu0 %v4399_v23  ;;  %v463_v23 = vunpack.c.h.bf16 %v5077_v4 }
  0xab   : > { %941 = vmatpush1.bf16.msra.mxu0 %v4397_v24 }
  0xac   : > { %942 = vmatprep.subr.bf16.mxu0 %v4403_v25 }
  0xae   : > { %3915 = vmatmul.mubr.bf16.gmra.mxu0 %v5087_v16 }
  0xaf   : > { %943 = vmatpush1.bf16.msra.mxu0 %v4401_v26  ;;  %970 = vmatprep.mubr.bf16.mxu0 %v4819_v10 }
  0xb0   : > { %944 = vmatprep.subr.bf16.mxu0 %v4407_v27 }
  0xb3   : > { %945 = vmatpush1.bf16.msra.mxu0 %v4405_v28 }
  0xb4   : > { %946 = vmatprep.subr.bf16.mxu0 %v4411_v29 }
  0xb7   : > { %947 = vmatpush1.bf16.msra.mxu0 %v4409_v30 }
  0xb8   : > { %948 = vmatprep.subr.bf16.mxu0 %v4415_v0 }
  0xbb   : > { %949 = vmatpush1.bf16.msra.mxu0 %v4413_v1 }
  0xbc   : > { %950 = vmatprep.subr.bf16.mxu0 %v4419_v3 }
  0xbf   : > { %951 = vmatpush1.bf16.msra.mxu0 %v4417_v5 }
  0xc0   : > { %952 = vmatprep.subr.bf16.mxu0 %v4423_v7 }
  0xc3   : > { %953 = vmatpush1.bf16.msra.mxu0 %v4421_v8 }
 0x166   : > { %v3912_v31 = vpop.f32.mrf.mxu0 }
 0x167   : > { %v588_v37 = vadd.f32 %v3912_v31, %v3672_v33 }
 0x168   : > { %v579_v32 = vpop.f32.mrf.mxu0 }
 0x169   : > { %v580_v35 = vadd.f32 %v3672_v33, %v579_v32  ;;  %v612_v44 = vmax.f32 %v588_v37, 0.0 }
 0x16a   : > { %v3913_v34 = vpop.f32.mrf.mxu0 }
 0x16b   : > { %v591_v36 = vadd.f32 %v3913_v34, %v3672_v33  ;;  %v610_v42 = vmax.f32 %v580_v35, 0.0 }
 0x16c   : > { %v582_v38 = vpop.f32.mrf.mxu0 }
 0x16d   : > { %v583_v39 = vadd.f32 %v3672_v33, %v582_v38  ;;  %v613_v40 = vmax.f32 %v591_v36, 0.0  ;;  %v469_v36 = vunpack.c.h.bf16 %v5087_v16  ;;  %v468_v38 = vunpack.c.l.bf16 %v5087_v16 }
 0x16e   : > { %v3916_v41 = vpop.f32.mrf.mxu0 }
 0x16f   : > { %v611_v43 = vmax.f32 %v583_v39, 0.0  ;;  %v604_v45 = vadd.f32 %v3916_v41, %v3672_v33  ;;  %v619_v49 = vpack.c.bf16 %v613_v40, %v612_v44 }
 0x170   : > { %v595_v46 = vpop.f32.mrf.mxu0 }
 0x171   : > { %v596_v47 = vadd.f32 %v3672_v33, %v595_v46  ;;  %v618_v48 = vpack.c.bf16 %v611_v43, %v610_v42  ;;  %v616_v53 = vmax.f32 %v604_v45, 0.0  ;;  %v467_v43 = vunpack.c.h.bf16 %v5084_v15 }
 0x172   : > { %v3917_v50 = vpop.f32.mrf.mxu0 }
 0x173   : > { %v607_v52 = vadd.f32 %v3917_v50, %v3672_v33  ;;  %3934 = vmatprep.mubr.bf16.mxu1 %v618_v48  ;;  %v614_v55 = vmax.f32 %v596_v47, 0.0 }
 0x174   : > { %v598_v54 = vpop.f32.mrf.mxu0  ;;  %3935 = vmatmul.mubr.bf16.vlgmr.msra.gmra.mxu1 %v619_v49 }
 0x175   : > { %v617_v56 = vmax.f32 %v607_v52, 0.0  ;;  %v599_v57 = vadd.f32 %v3672_v33, %v598_v54  ;;  %3943 = vmatpush3.bf16.msra.mxu1 %v4396_v22 }
 0x176   : > { %3944 = vmatprep.subr.bf16.mxu1 %v4400_v51 }
 0x177   : > { %v615_v59 = vmax.f32 %v599_v57, 0.0  ;;  %v621_v60 = vpack.c.bf16 %v617_v56, %v616_v53 }
 0x179   : > { %v620_v61 = vpack.c.bf16 %v615_v59, %v614_v55  ;;  %3945 = vmatpush3.bf16.msra.mxu1 %v4400_v51  ;;  %v5753_v55 = vmov 0.0  }
 0x17a   : > { %3946 = vmatprep.subr.bf16.mxu1 %v4404_v58  ;;  %3978 = vmatprep.subr.bf16.mxu0 %v5753_v55 }
 0x17b   : > { %3938 = vmatprep.mubr.bf16.mxu1 %v620_v61 }
 0x17c   : > { %3939 = vmatmul.mubr.bf16.gmra.mxu1 %v621_v60 }
 0x17d   : > { %3947 = vmatpush3.bf16.msra.mxu1 %v4404_v58 }
 0x17e   : > { %3948 = vmatprep.subr.bf16.mxu1 %v4408_v62 }
 0x181   : > { %3949 = vmatpush3.bf16.msra.mxu1 %v4408_v62 }
 0x182   : > { %3950 = vmatprep.subr.bf16.mxu1 %v4412_v63 }
 0x185   : > { %3951 = vmatpush3.bf16.msra.mxu1 %v4412_v63 }
 0x186   : > { %3952 = vmatprep.subr.bf16.mxu1 %v4416_v2 }
 0x189   : > { %3953 = vmatpush3.bf16.msra.mxu1 %v4416_v2 }
 0x18a   : > { %3954 = vmatprep.subr.bf16.mxu1 %v4420_v6 }
 0x18d   : > { %3955 = vmatpush3.bf16.msra.mxu1 %v4420_v6 }
 0x18e   : > { %3956 = vmatprep.subr.bf16.mxu1 %v4424_v9 }
 0x191   : > { %3957 = vmatpush3.bf16.msra.mxu1 %v4424_v9 }
 0x192   : > { %3966 = vmatprep.subr.bf16.mxu1 %v5753_v55 }
 0x234   : > { %v3936_v11 = vpop.f32.mrf.mxu1 }
 0x235   : > { %v736_v21 = vadd.f32 %v3936_v11, %v3681_v12 }
 0x236   : > { %v727_v13 = vpop.f32.mrf.mxu1 }
 0x237   : > { %v728_v18 = vadd.f32 %v3681_v12, %v727_v13  ;;  %v5106_v29 = vadd.f32 %v736_v21, %v464_v20 }
 0x238   : > { %v3937_v22 = vpop.f32.mrf.mxu1 }
 0x239   : > { %v739_v24 = vadd.f32 %v3937_v22, %v3681_v12  ;;  %v5102_v26 = vadd.f32 %v728_v18, %v462_v17  ;;  %v5750_v37 = vmax.f32 %v5106_v29, 0.0 }
 0x23a   : > { %v730_v25 = vpop.f32.mrf.mxu1 }
 0x23b   : > { %v5104_v27 = vadd.f32 %v739_v24, %v465_v19  ;;  %v731_v28 = vadd.f32 %v3681_v12, %v730_v25  ;;  %v5752_v34 = vmax.f32 %v5102_v26, 0.0 }
 0x23c   : > { %v3940_v30 = vpop.f32.mrf.mxu1 }
 0x23d   : > { %v5108_v31 = vadd.f32 %v731_v28, %v463_v23  ;;  %v5751_v32 = vmax.f32 %v5104_v27, 0.0  ;;  %v752_v39 = vadd.f32 %v3940_v30, %v3681_v12 }
 0x23e   : > { %v743_v33 = vpop.f32.mrf.mxu1 }
 0x23f   : > { %v5749_v4 = vmax.f32 %v5108_v31, 0.0  ;;  %v744_v35 = vadd.f32 %v3681_v12, %v743_v33  ;;  %v775_v44 = vpack.c.bf16 %v5751_v32, %v5750_v37  ;;  %v5130_v48 = vadd.f32 %v752_v39, %v468_v38 }
 0x240   : > { %v3941_v40 = vpop.f32.mrf.mxu1 }
 0x241   : > { %v774_v41 = vpack.c.bf16 %v5749_v4, %v5752_v34  ;;  %v755_v42 = vadd.f32 %v3941_v40, %v3681_v12  ;;  %v5126_v46 = vadd.f32 %v744_v35, %v466_v14  ;;  %v5746_v52 = vmax.f32 %v5130_v48, 0.0 }
 0x242   : > { %v746_v45 = vpop.f32.mrf.mxu1 }
 0x243   : > { %v5128_v47 = vadd.f32 %v755_v42, %v469_v36  ;;  %v747_v16 = vadd.f32 %v3681_v12, %v746_v45  ;;  %971 = vmatmul.mubr.bf16.vlgmr.msra.gmra.mxu0 %v774_v41  ;;  %3958 = vmatprep.mubr.bf16.mxu1 %v774_v41  ;;  %v5748_v50 = vmax.f32 %v5126_v46, 0.0 }
 0x244   : > { %3959 = vmatmul.mubr.bf16.vlgmr.msra.gmra.mxu1 %v775_v44  ;;  %980 = vmatprep.mubr.bf16.mxu0 %v4819_v10 }
 0x245   : > { %v5132_v49 = vadd.f32 %v747_v16, %v467_v43  ;;  %v5747_v15 = vmax.f32 %v5128_v47, 0.0 }
 0x247   : > { %v5745_v51 = vmax.f32 %v5132_v49, 0.0  ;;  %v777_v54 = vpack.c.bf16 %v5747_v15, %v5746_v52 }
 0x249   : > { %v776_v53 = vpack.c.bf16 %v5745_v51, %v5748_v50 }
 0x24b   : > { %981 = vmatmul.mubr.bf16.gmra.mxu0 %v775_v44  ;;  %3962 = vmatprep.mubr.bf16.mxu1 %v776_v53 }
 0x24c   : > { %3963 = vmatmul.mubr.bf16.gmra.mxu1 %v777_v54  ;;  %990 = vmatprep.mubr.bf16.mxu0 %v4819_v10 }
 0x24d   : > { %3968 = vmatprep.mubr.msk.bf16.mxu1 %vm4821_vm0, %v5753_v55 }
 0x253   : > { %991 = vmatmul.mubr.bf16.gmra.mxu0 %v776_v53 }
 0x254   : > { %1000 = vmatprep.mubr.bf16.mxu0 %v4819_v10 }
 0x25b   : > { %1001 = vmatmul.mubr.bf16.gmra.mxu0 %v777_v54 }
 0x25c   : > { %3980 = vmatprep.mubr.msk.bf16.mxu0 %vm4821_vm0, %v5753_v55 }
 0x303   : > { %v972_v56 = vpop.f32.mrf.mxu0 }
 0x304   : > { %v3960_v57 = vpop.f32.mrf.mxu1 }
 0x305   : > { %v974_v58 = vpop.f32.mrf.mxu0 }
 0x306   : > { %v1045_v59 = vpop.f32.mrf.mxu1 }
 0x307   : > { %v976_v60 = vpop.f32.mrf.mxu0 }
 0x308   : > { %v3961_v61 = vpop.f32.mrf.mxu1  ;;  %v5161_v11 = vpack.c.bf16 %v976_v60, %v972_v56 }
 0x309   : > { %v978_v62 = vpop.f32.mrf.mxu0  ;;  %v5200_v39 = vpack.c.bf16 %v3961_v61, %v3960_v57 }
 0x30a   : > { %v5152_v63 = vpack.c.bf16 %v978_v62, %v974_v58  ;;  %v1048_v0 = vpop.f32.mrf.mxu1 }
 0x30b   : > { %v982_v1 = vpop.f32.mrf.mxu0  ;;  %v5187_v35 = vpack.c.bf16 %v1048_v0, %v1045_v59 }
 0x30c   : > { %v3964_v2 = vpop.f32.mrf.mxu1  ;;  %v1093_v3 = vsel %vm1088_vm1, %v5152_v63, 0 }
 0x30d   : > { %v984_v5 = vpop.f32.mrf.mxu0  ;;  %3967 = vmatpush3.bf16.xpose.msra.mxu1 %v1093_v3 }
 0x30e   : > { %v5156_v6 = vpop.f32.mrf.mxu1  ;;  %3972 = vmatprep.subr.bf16.mxu1 %v5753_v55 }
 0x30f   : > { %v986_v7 = vpop.f32.mrf.mxu0 }
 0x310   : > { %v3965_v8 = vpop.f32.mrf.mxu1  ;;  %v5172_v21 = vpack.c.bf16 %v986_v7, %v982_v1 }
 0x311   : > { %v5159_v9 = vpack.c.bf16 %v3965_v8, %v3964_v2  ;;  %v988_v10 = vpop.f32.mrf.mxu0 }
 0x312   : > { %v5163_v12 = vpack.c.bf16 %v988_v10, %v984_v5  ;;  %v5208_v40 = vpop.f32.mrf.mxu1 }
 0x313   : > { %v992_v13 = vpop.f32.mrf.mxu0 }
 0x314   : > { %3969 = vmatmul.mubr.msk.bf16.vlgmr.msra.gmra.mxu1 %vm1088_vm1, %v5161_v11  ;;  %v1140_v17 = vsel %vm1088_vm1, %v5163_v12, 0 }
 0x315   : > { %v994_v18 = vpop.f32.mrf.mxu0  ;;  %3973 = vmatpush3.bf16.xpose.msra.mxu1 %v1140_v17  ;;  %3974 = vmatprep.mubr.msk.bf16.mxu1 %vm4821_vm0, %v5753_v55 }
 0x316   : > { %3984 = vmatprep.subr.bf16.mxu1 %v5753_v55 }
 0x317   : > { %v996_v19 = vpop.f32.mrf.mxu0 }
 0x318   : > { %v5183_v14 = vpack.c.bf16 %v996_v19, %v992_v13 }
 0x319   : > { %v998_v20 = vpop.f32.mrf.mxu0 }
 0x31a   : > { %v5174_v22 = vpack.c.bf16 %v998_v20, %v994_v18 }
 0x31b   : > { %v1002_v23 = vpop.f32.mrf.mxu0 }
 0x31c   : > { %3975 = vmatmul.mubr.msk.bf16.vlgmr.msra.gmra.mxu1 %vm1088_vm1, %v5172_v21  ;;  %v1187_v24 = vsel %vm1088_vm1, %v5174_v22, 0 }
 0x31d   : > { %v1004_v25 = vpop.f32.mrf.mxu0  ;;  %3979 = vmatpush3.bf16.xpose.msra.mxu0 %v1187_v24  ;;  %3986 = vmatprep.mubr.msk.bf16.mxu1 %vm4821_vm0, %v5753_v55 }
 0x31e   : > { %3990 = vmatprep.subr.bf16.mxu0 %v5753_v55 }
 0x31f   : > { %v1006_v28 = vpop.f32.mrf.mxu0 }
 0x320   : > { %v5198_v38 = vpack.c.bf16 %v1006_v28, %v1002_v23 }
 0x321   : > { %v1008_v30 = vpop.f32.mrf.mxu0 }
 0x322   : > { %v5185_v33 = vpack.c.bf16 %v1008_v30, %v1004_v25 }
 0x324   : > { %3981 = vmatmul.mubr.msk.bf16.vlgmr.msra.gmra.mxu0 %vm1088_vm1, %v5183_v14  ;;  %v1234_v36 = vsel %vm1088_vm1, %v5185_v33, 0 }
 0x325   : > { %3985 = vmatpush3.bf16.xpose.msra.mxu1 %v1234_v36  ;;  %3991 = vmatpush3.bf16.msra.mxu0 %v5187_v35 }
 0x326   : > { %3996 = vmatprep.subr.bf16.mxu1 %v5753_v55  ;;  %3992 = vmatprep.mubr.msk.bf16.mxu0 %vm4821_vm0, %v5753_v55 }
 0x327   : > { %4002 = vmatprep.subr.bf16.mxu0 %v5753_v55 }
 0x32c   : > { %3987 = vmatmul.mubr.msk.bf16.vlgmr.msra.gmra.mxu1 %vm1088_vm1, %v5198_v38 }
 0x32d   : > { %3997 = vmatpush3.bf16.msra.mxu1 %v5200_v39  ;;  %3998 = vmatprep.mubr.msk.bf16.mxu1 %vm4821_vm0, %v5753_v55 }
 0x32e   : > { %4008 = vmatprep.subr.bf16.mxu1 %v5753_v55 }
 0x3d4   : > { %v1129_v41 = vpop.f32.mrf.mxu1 }
 0x3d5   : > { %v1277_v42 = vmul.f32 0.17677669, %v1129_v41 }
 0x3d6   : > { %v3970_v43 = vpop.f32.mrf.mxu1 }
 0x3d7   : > { %v1286_v44 = vsel %vm1285_vm2, %v1277_v42, -inf }
 0x3d8   : > { %1287 = vmax.xlane.f32.xlu0 %v1286_v44  ;;  %v1132_v45 = vpop.f32.mrf.mxu1 }
 0x3d9   : > { %v1278_v16 = vmul.f32 0.17677669, %v1132_v45 }
 0x3da   : > { %v3971_v53 = vpop.f32.mrf.mxu1 }
 0x3db   : > { %v1289_v54 = vsel %vm1285_vm2, %v1278_v16, -inf }
 0x3dc   : > { %1290 = vmax.xlane.f32.xlu0 %v1289_v54  ;;  %v1176_v56 = vpop.f32.mrf.mxu1 }
 0x3dd   : > { %v1279_v57 = vmul.f32 0.17677669, %v1176_v56 }
 0x3de   : > { %v3976_v58 = vpop.f32.mrf.mxu1 }
 0x3df   : > { %v1292_v59 = vsel %vm1285_vm2, %v1279_v57, -inf }
 0x3e0   : > { %1293 = vmax.xlane.f32.xlu1 %v1292_v59  ;;  %v1179_v60 = vpop.f32.mrf.mxu1 }
 0x3e1   : > { %v1280_v61 = vmul.f32 0.17677669, %v1179_v60 }
 0x3e2   : > { %v3977_v62 = vpop.f32.mrf.mxu1 }
 0x3e3   : > { %v1295_v0 = vsel %vm1285_vm2, %v1280_v61, -inf }
 0x3e4   : > { %1296 = vmax.xlane.f32.xlu1 %v1295_v0  ;;  %v1223_v1 = vpop.f32.mrf.mxu0 }
 0x3e5   : > { %v1281_v2 = vmul.f32 0.17677669, %v1223_v1 }
 0x3e6   : > { %v3982_v3 = vpop.f32.mrf.mxu0 }
 0x3e7   : > { %v1298_v5 = vsel %vm1285_vm2, %v1281_v2, -inf }
 0x3e8   : > { %1299 = vmax.xlane.f32.xlu0 %v1298_v5  ;;  %v1226_v7 = vpop.f32.mrf.mxu0 }
 0x3e9   : > { %v1282_v8 = vmul.f32 0.17677669, %v1226_v7 }
 0x3ea   : > { %v3983_v10 = vpop.f32.mrf.mxu0 }
 0x3eb   : > { %v1301_v13 = vsel %vm1285_vm2, %v1282_v8, -inf }
 0x3ec   : > { %1302 = vmax.xlane.f32.xlu1 %v1301_v13  ;;  %v1270_v17 = vpop.f32.mrf.mxu1 }
 0x3ed   : > { %v1283_v18 = vmul.f32 0.17677669, %v1270_v17 }
 0x3ee   : > { %v3988_v19 = vpop.f32.mrf.mxu1 }
 0x3ef   : > { %v1304_v20 = vsel %vm1285_vm2, %v1283_v18, -inf }
 0x3f0   : > { %1305 = vmax.xlane.f32.xlu0 %v1304_v20  ;;  %v1273_v23 = vpop.f32.mrf.mxu1 }
 0x3f1   : > { %v1284_v24 = vmul.f32 0.17677669, %v1273_v23 }
 0x3f2   : > { %v3989_v25 = vpop.f32.mrf.mxu1 }
 0x3f3   : > { %v1307_v28 = vsel %vm1285_vm2, %v1284_v24, -inf }
 0x3f4   : > { %1308 = vmax.xlane.f32.xlu1 %v1307_v28 }
 0x461   : > { %v1288_v30 = vpop.xlane.xlu0 %1287 }
 0x462   : > { %v1310_v36 = vsub.f32 %v1277_v42, %v1288_v30 }
 0x464   : > { %v1318_v41 = vmul.f32 1.442695, %v1310_v36 }
 0x465   : > { %v1291_v43 = vpop.xlane.xlu0 %1290 }
 0x466   : > { %4445 = vpow2.f32 %v1318_v41  ;;  %v1311_v44 = vsub.f32 %v1278_v16, %v1291_v43 }
 0x468   : > { %v1320_v45 = vmul.f32 1.442695, %v1311_v44 }
 0x469   : > { %v1294_v53 = vpop.xlane.xlu1 %1293 }
 0x46a   : > { %4447 = vpow2.f32 %v1320_v45  ;;  %v1312_v54 = vsub.f32 %v1279_v57, %v1294_v53 }
 0x46c   : > { %v1322_v56 = vmul.f32 1.442695, %v1312_v54 }
 0x46d   : > { %v1297_v58 = vpop.xlane.xlu1 %1296 }
 0x46e   : > { %4449 = vpow2.f32 %v1322_v56  ;;  %v1313_v59 = vsub.f32 %v1280_v61, %v1297_v58 }
 0x470   : > { %v1324_v60 = vmul.f32 1.442695, %v1313_v59 }
 0x471   : > { %v1300_v62 = vpop.xlane.xlu0 %1299 }
 0x472   : > { %4451 = vpow2.f32 %v1324_v60  ;;  %v1314_v0 = vsub.f32 %v1281_v2, %v1300_v62 }
 0x473   : > { %v4446_v1 = vpop.eup %4445 }
 0x474   : > { %v1326_v3 = vmul.f32 1.442695, %v1314_v0  ;;  %v1334_v42 = vsel %vm1285_vm2, %v4446_v1, 0.0 }
 0x475   : > { %v1303_v5 = vpop.xlane.xlu1 %1302  ;;  %1335 = vadd.xlane.f32.xlu0 %v1334_v42 }
 0x476   : > { %4453 = vpow2.f32 %v1326_v3  ;;  %v1315_v16 = vsub.f32 %v1282_v8, %v1303_v5 }
 0x477   : > { %v4448_v7 = vpop.eup %4447 }
 0x478   : > { %v1328_v10 = vmul.f32 1.442695, %v1315_v16  ;;  %v1337_v57 = vsel %vm1285_vm2, %v4448_v7, 0.0  ;;  %v5250_v16 = vpack.c.bf16 %v5208_v40, %v5156_v6 }
 0x479   : > { %v1306_v13 = vpop.xlane.xlu0 %1305  ;;  %1338 = vadd.xlane.f32.xlu1 %v1337_v57 }
 0x47a   : > { %4455 = vpow2.f32 %v1328_v10  ;;  %v1316_v61 = vsub.f32 %v1283_v18, %v1306_v13 }
 0x47b   : > { %v4450_v17 = vpop.eup %4449 }
 0x47c   : > { %v1330_v19 = vmul.f32 1.442695, %v1316_v61  ;;  %v1340_v2 = vsel %vm1285_vm2, %v4450_v17, 0.0 }
 0x47d   : > { %1341 = vadd.xlane.f32.xlu0 %v1340_v2  ;;  %v1309_v41 = vpop.xlane.xlu1 %1308 }
 0x47e   : > { %4457 = vpow2.f32 %v1330_v19  ;;  %v1317_v43 = vsub.f32 %v1284_v24, %v1309_v41 }
 0x47f   : > { %v4452_v20 = vpop.eup %4451 }
 0x480   : > { %v1343_v23 = vsel %vm1285_vm2, %v4452_v20, 0.0  ;;  %v1332_v44 = vmul.f32 1.442695, %v1317_v43 }
 0x481   : > { %1344 = vadd.xlane.f32.xlu1 %v1343_v23 }
 0x482   : > { %4459 = vpow2.f32 %v1332_v44 }
 0x483   : > { %v4454_v25 = vpop.eup %4453 }
 0x484   : > { %v1346_v8 = vsel %vm1285_vm2, %v4454_v25, 0.0 }
 0x485   : > { %1347 = vadd.xlane.f32.xlu0 %v1346_v8 }
 0x487   : > { %v4456_v28 = vpop.eup %4455 }
 0x488   : > { %v1349_v30 = vsel %vm1285_vm2, %v4456_v28, 0.0 }
 0x489   : > { %1350 = vadd.xlane.f32.xlu1 %v1349_v30 }
 0x48b   : > { %v5224_v36 = vpop.eup %4457 }
 0x48c   : > { %v1352_v18 = vsel %vm1285_vm2, %v5224_v36, 0.0 }
 0x48d   : > { %1353 = vadd.xlane.f32.xlu0 %v1352_v18 }
 0x48f   : > { %v5238_v45 = vpop.eup %4459 }
 0x490   : > { %v1355_v53 = vsel %vm1285_vm2, %v5238_v45, 0.0 }
 0x49a   : > { %1611 = vrot.lane.b32.xlu1 %v5163_v12, %s4822_s12 }
 0x49e   : > { %1555 = vrot.lane.b32.xlu1 %v5161_v11, %s4822_s12 }
 0x4a3   : > { %1558 = vrot.lane.b32.xlu0 %v5152_v63, %s4822_s12 }
 0x4a7   : > { %1608 = vrot.lane.b32.xlu0 %v5172_v21, %s4822_s12 }
 0x4ab   : > { %1661 = vrot.lane.b32.xlu0 %v5183_v14, %s4822_s12 }
 0x4c2   : > { %1356 = vadd.xlane.f32.xlu1 %v1355_v53 }
 0x4d3   : > { %1664 = vrot.lane.b32.xlu1 %v5174_v22, %s4822_s12 }
 0x4d7   : > { %1717 = vrot.lane.b32.xlu1 %v5185_v33, %s4822_s12 }
 0x4db   : > { %1714 = vrot.lane.b32.xlu1 %v5198_v38, %s4822_s12 }
 0x4fe   : > { %v1336_v24 = vpop.xlane.xlu0 %1335 }
 0x4ff   : > { %4461 = vrcp.f32 %v1336_v24 }
 0x502   : > { %v1339_v54 = vpop.xlane.xlu1 %1338 }
 0x503   : > { %4463 = vrcp.f32 %v1339_v54 }
 0x506   : > { %v1342_v56 = vpop.xlane.xlu0 %1341 }
 0x507   : > { %4465 = vrcp.f32 %v1342_v56 }
 0x50a   : > { %v1345_v58 = vpop.xlane.xlu1 %1344 }
 0x50b   : > { %4467 = vrcp.f32 %v1345_v58 }
 0x50c   : > { %v4462_v59 = vpop.eup %4461 }
 0x50d   : > { %v1366_v0 = vmul.f32 %v4462_v59, %v4446_v1 }
 0x50e   : > { %v1348_v60 = vpop.xlane.xlu0 %1347 }
 0x50f   : > { %4469 = vrcp.f32 %v1348_v60 }
 0x510   : > { %v4464_v62 = vpop.eup %4463 }
 0x511   : > { %v1367_v3 = vmul.f32 %v4464_v62, %v4448_v7 }
 0x512   : > { %v1351_v42 = vpop.xlane.xlu1 %1350 }
 0x513   : > { %4471 = vrcp.f32 %v1351_v42  ;;  %v1374_v5 = vpack.c.bf16 %v1367_v3, %v1366_v0 }
 0x514   : > { %v4466_v10 = vpop.eup %4465 }
 0x515   : > { %3993 = vmatmul.mubr.msk.bf16.vlgmr.msra.gmra.mxu0 %vm1285_vm2, %v1374_v5  ;;  %v1368_v1 = vmul.f32 %v4466_v10, %v4450_v17 }
 0x516   : > { %4003 = vmatpush3.bf16.msra.mxu0 %v5250_v16  ;;  %4004 = vmatprep.mubr.msk.bf16.mxu0 %vm4821_vm0, %v5753_v55  ;;  %v1354_v61 = vpop.xlane.xlu0 %1353 }
 0x517   : > { %4014 = vmatprep.subr.bf16.mxu0 %v5753_v55  ;;  %4473 = vrcp.f32 %v1354_v61 }
 0x518   : > { %v4468_v57 = vpop.eup %4467 }
 0x519   : > { %v1369_v7 = vmul.f32 %v4468_v57, %v4452_v20  ;;  %v1612_v20 = vpop.permute.xlu1 %1611 }
 0x51a   : > { %v1559_v23 = vpop.permute.xlu0 %1558  ;;  %v1617_v58 = vsel %vm1088_vm1, %v1612_v20, 0 }
 0x51b   : > { %v1375_v13 = vpack.c.bf16 %v1369_v7, %v1368_v1  ;;  %v1564_v17 = vsel %vm1088_vm1, %v1559_v23, 0 }
 0x51c   : > { %v4470_v19 = vpop.eup %4469 }
 0x51d   : > { %3999 = vmatmul.mubr.msk.bf16.vlgmr.msra.gmra.mxu1 %vm1285_vm2, %v1375_v13  ;;  %v1370_v40 = vmul.f32 %v4470_v19, %v4454_v25  ;;  %v1556_v30 = vpop.permute.xlu1 %1555 }
 0x51e   : > { %4009 = vmatpush3.bf16.msra.mxu1 %v5159_v9  ;;  %4010 = vmatprep.mubr.msk.bf16.mxu1 %vm4821_vm0, %v5753_v55  ;;  %v1609_v41 = vpop.permute.xlu0 %1608 }
 0x51f   : > { %4020 = vmatprep.subr.bf16.mxu1 %v5753_v55 }
 0x520   : > { %v4472_v6 = vpop.eup %4471 }
 0x521   : > { %v1371_v2 = vmul.f32 %v4472_v6, %v4456_v28 }
 0x522   : > { %v1662_v44 = vpop.permute.xlu0 %1661 }
 0x523   : > { %v1376_v8 = vpack.c.bf16 %v1371_v2, %v1370_v40 }
 0x524   : > { %v4474_v43 = vpop.eup %4473 }
 0x525   : > { %4005 = vmatmul.mubr.msk.bf16.vlgmr.msra.gmra.mxu0 %vm1285_vm2, %v1376_v8  ;;  %v1372_v24 = vmul.f32 %v4474_v43, %v5224_v36 }
 0x526   : > { %4015 = vmatpush3.bf16.xpose.msra.mxu0 %v1564_v17  ;;  %4016 = vmatprep.mubr.msk.bf16.mxu0 %vm4821_vm0, %v5753_v55 }
 0x527   : > { %4026 = vmatprep.subr.bf16.mxu0 %v5753_v55 }
 0x52d   : > { %4017 = vmatmul.mubr.msk.bf16.vlgmr.msra.gmra.mxu0 %vm1088_vm1, %v1556_v30 }
 0x52e   : > { %4028 = vmatprep.mubr.msk.bf16.mxu0 %vm4821_vm0, %v5753_v55 }
 0x54b   : > { %v1357_v25 = vpop.xlane.xlu1 %1356 }
 0x54c   : > { %4475 = vrcp.f32 %v1357_v25 }
 0x54f   : > { %v1665_v28 = vpop.permute.xlu1 %1664 }
 0x550   : > { %v1670_v18 = vsel %vm1088_vm1, %v1665_v28, 0 }
 0x551   : > { %4027 = vmatpush3.bf16.xpose.msra.mxu0 %v1670_v18 }
 0x552   : > { %4038 = vmatprep.subr.bf16.mxu0 %v5753_v55 }
 0x553   : > { %v1718_v59 = vpop.permute.xlu1 %1717 }
 0x554   : > { %v1723_v60 = vsel %vm1088_vm1, %v1718_v59, 0 }
 0x557   : > { %v1715_v36 = vpop.permute.xlu1 %1714 }
 0x558   : > { %4029 = vmatmul.mubr.msk.bf16.vlgmr.msra.gmra.mxu0 %vm1088_vm1, %v1662_v44 }
 0x559   : > { %v4476_v53 = vpop.eup %4475  ;;  %4040 = vmatprep.mubr.msk.bf16.mxu0 %vm4821_vm0, %v5753_v55 }
 0x55a   : > { %v1373_v54 = vmul.f32 %v4476_v53, %v5238_v45 }
 0x55c   : > { %v1377_v56 = vpack.c.bf16 %v1373_v54, %v1372_v24 }
 0x55e   : > { %4011 = vmatmul.mubr.msk.bf16.vlgmr.msra.gmra.mxu1 %vm1285_vm2, %v1377_v56 }
 0x55f   : > { %4021 = vmatpush3.bf16.xpose.msra.mxu1 %v1617_v58  ;;  %4022 = vmatprep.mubr.msk.bf16.mxu1 %vm4821_vm0, %v5753_v55 }
 0x560   : > { %4032 = vmatprep.subr.bf16.mxu1 %v5753_v55 }
 0x566   : > { %4023 = vmatmul.mubr.msk.bf16.vlgmr.msra.gmra.mxu1 %vm1088_vm1, %v1609_v41 }
 0x567   : > { %4033 = vmatpush3.bf16.xpose.msra.mxu1 %v1723_v60  ;;  %4034 = vmatprep.mubr.msk.bf16.mxu1 %vm4821_vm0, %v5753_v55 }
 0x568   : > { %4044 = vmatprep.subr.bf16.mxu1 %v5753_v55 }
 0x56e   : > { %4035 = vmatmul.mubr.msk.bf16.vlgmr.msra.gmra.mxu1 %vm1088_vm1, %v1715_v36 }
 0x56f   : > { %4046 = vmatprep.mubr.msk.bf16.mxu1 %vm4821_vm0, %v5753_v55 }
 0x5d5   : > { %v5290_v45 = vpop.f32.mrf.mxu0 }
 0x5d7   : > { %v3994_v62 = vpop.f32.mrf.mxu0 }
 0x5d9   : > { %v5292_v0 = vpop.f32.mrf.mxu0 }
 0x5db   : > { %v3995_v3 = vpop.f32.mrf.mxu0 }
 0x5dd   : > { %v5294_v42 = vpop.f32.mrf.mxu1 }
 0x5df   : > { %v4000_v5 = vpop.f32.mrf.mxu1 }
 0x5e1   : > { %v5296_v10 = vpop.f32.mrf.mxu1 }
 0x5e3   : > { %v4001_v57 = vpop.f32.mrf.mxu1 }
 0x5e5   : > { %v5298_v1 = vpop.f32.mrf.mxu0 }
 0x5e7   : > { %v4006_v7 = vpop.f32.mrf.mxu0 }
 0x5e9   : > { %v5300_v13 = vpop.f32.mrf.mxu0 }
 0x5eb   : > { %v4007_v61 = vpop.f32.mrf.mxu0 }
 0x5ed   : > { %v1600_v19 = vpop.f32.mrf.mxu0 }
 0x5ee   : > { %v1766_v6 = vmul.f32 0.17677669, %v1600_v19 }
 0x5ef   : > { %v4018_v40 = vpop.f32.mrf.mxu0 }
 0x5f0   : > { %v1774_v2 = vsel %vm1285_vm2, %v1766_v6, -inf }
 0x5f1   : > { %1775 = vmax.xlane.f32.xlu0 %v1774_v2  ;;  %v1603_v23 = vpop.f32.mrf.mxu0 }
 0x5f2   : > { %v1767_v8 = vmul.f32 0.17677669, %v1603_v23 }
 0x5f3   : > { %v4019_v17 = vpop.f32.mrf.mxu0 }
 0x5f4   : > { %v1777_v20 = vsel %vm1285_vm2, %v1767_v8, -inf }
 0x5f5   : > { %1778 = vmax.xlane.f32.xlu1 %v1777_v20 }
 0x618   : > { %v1706_v30 = vpop.f32.mrf.mxu0 }
 0x619   : > { %v1770_v5 = vmul.f32 0.17677669, %v1706_v30 }
 0x61a   : > { %v4030_v25 = vpop.f32.mrf.mxu0 }
 0x61b   : > { %v1786_v40 = vsel %vm1285_vm2, %v1770_v5, -inf }
 0x61c   : > { %v1709_v28 = vpop.f32.mrf.mxu0 }
 0x61d   : > { %v1771_v18 = vmul.f32 0.17677669, %v1709_v28 }
 0x61e   : > { %v5304_v41 = vpop.f32.mrf.mxu1  ;;  %v4031_v43 = vpop.f32.mrf.mxu0 }
 0x61f   : > { %v1789_v44 = vsel %vm1285_vm2, %v1771_v18, -inf }
 0x620   : > { %1790 = vmax.xlane.f32.xlu1 %v1789_v44  ;;  %v4012_v53 = vpop.f32.mrf.mxu1 }
 0x622   : > { %v5307_v24 = vpop.f32.mrf.mxu1 }
 0x624   : > { %v4013_v54 = vpop.f32.mrf.mxu1 }
 0x626   : > { %v1653_v56 = vpop.f32.mrf.mxu1 }
 0x627   : > { %v1768_v58 = vmul.f32 0.17677669, %v1653_v56 }
 0x628   : > { %v4024_v59 = vpop.f32.mrf.mxu1 }
 0x629   : > { %v1780_v60 = vsel %vm1285_vm2, %v1768_v58, -inf }
 0x62a   : > { %1781 = vmax.xlane.f32.xlu0 %v1780_v60  ;;  %v1656_v36 = vpop.f32.mrf.mxu1 }
 0x62b   : > { %v1769_v62 = vmul.f32 0.17677669, %v1656_v36 }
 0x62c   : > { %v4025_v3 = vpop.f32.mrf.mxu1 }
 0x62d   : > { %v1783_v57 = vsel %vm1285_vm2, %v1769_v62, -inf }
 0x62e   : > { %1784 = vmax.xlane.f32.xlu0 %v1783_v57  ;;  %v1759_v7 = vpop.f32.mrf.mxu1 }
 0x62f   : > { %v1772_v19 = vmul.f32 0.17677669, %v1759_v7 }
 0x630   : > { %v4036_v61 = vpop.f32.mrf.mxu1 }
 0x631   : > { %1915 = vrot.lane.b32.xlu1 %v5200_v39, %s4822_s12  ;;  %v1792_v17 = vsel %vm1285_vm2, %v1772_v19, -inf }
 0x632   : > { %1787 = vmax.xlane.f32.xlu0 %v1786_v40  ;;  %v1762_v2 = vpop.f32.mrf.mxu1 }
 0x633   : > { %v5319_v20 = vmul.f32 0.17677669, %v1762_v2 }
 0x634   : > { %v4037_v23 = vpop.f32.mrf.mxu1 }
 0x635   : > { %1963 = vrot.lane.b32.xlu1 %v5250_v16, %s4822_s12  ;;  %v1795_v30 = vsel %vm1285_vm2, %v5319_v20, -inf }
 0x636   : > { %1793 = vmax.xlane.f32.xlu0 %v1792_v17 }
 0x64c   : > { %1867 = vrot.lane.b32.xlu0 %v5187_v35, %s4822_s12 }
 0x659   : > { %1796 = vmax.xlane.f32.xlu1 %v1795_v30 }
 0x66a   : > { %2011 = vrot.lane.b32.xlu1 %v5159_v9, %s4822_s12 }
 0x67a   : > { %v1776_v25 = vpop.xlane.xlu0 %1775 }
 0x67b   : > { %v1798_v28 = vsub.f32 %v1766_v6, %v1776_v25 }
 0x67d   : > { %v1806_v43 = vmul.f32 1.442695, %v1798_v28 }
 0x67e   : > { %v1779_v44 = vpop.xlane.xlu1 %1778 }
 0x67f   : > { %4477 = vpow2.f32 %v1806_v43  ;;  %v1799_v53 = vsub.f32 %v1767_v8, %v1779_v44 }
 0x681   : > { %v1808_v54 = vmul.f32 1.442695, %v1799_v53 }
 0x683   : > { %4479 = vpow2.f32 %v1808_v54 }
 0x68c   : > { %v5325_v56 = vpop.eup %4477 }
 0x68d   : > { %v1822_v59 = vsel %vm1285_vm2, %v5325_v56, 0.0 }
 0x68e   : > { %1823 = vadd.xlane.f32.xlu0 %v1822_v59 }
 0x690   : > { %v5329_v60 = vpop.eup %4479 }
 0x691   : > { %v1825_v36 = vsel %vm1285_vm2, %v5329_v60, 0.0 }
 0x692   : > { %1826 = vadd.xlane.f32.xlu1 %v1825_v36 }
 0x6a9   : > { %v1791_v3 = vpop.xlane.xlu1 %1790 }
 0x6aa   : > { %v1803_v7 = vsub.f32 %v1771_v18, %v1791_v3 }
 0x6ac   : > { %v1816_v23 = vmul.f32 1.442695, %v1803_v7 }
 0x6ad   : > { %v1916_v6 = vpop.permute.xlu1 %1915 }
 0x6ae   : > { %4045 = vmatpush3.bf16.msra.mxu1 %v1916_v6 }
 0x6af   : > { %4056 = vmatprep.subr.bf16.mxu1 %v5753_v55 }
 0x6b3   : > { %v1782_v8 = vpop.xlane.xlu0 %1781 }
 0x6b4   : > { %v1800_v57 = vsub.f32 %v1768_v58, %v1782_v8 }
 0x6b6   : > { %v1810_v61 = vmul.f32 1.442695, %v1800_v57  ;;  %v1964_v57 = vpop.permute.xlu1 %1963 }
 0x6b7   : > { %v1785_v40 = vpop.xlane.xlu0 %1784 }
 0x6b8   : > { %4481 = vpow2.f32 %v1810_v61  ;;  %v1801_v2 = vsub.f32 %v1769_v62, %v1785_v40 }
 0x6ba   : > { %v1812_v17 = vmul.f32 1.442695, %v1801_v2 }
 0x6bb   : > { %v1788_v30 = vpop.xlane.xlu0 %1787 }
 0x6bc   : > { %4483 = vpow2.f32 %v1812_v17  ;;  %v1802_v25 = vsub.f32 %v1770_v5, %v1788_v30 }
 0x6bd   : > { %4485 = vpow2.f32 %v1816_v23 }
 0x6be   : > { %v1814_v28 = vmul.f32 1.442695, %v1802_v25 }
 0x6bf   : > { %v1794_v43 = vpop.xlane.xlu0 %1793 }
 0x6c0   : > { %4487 = vpow2.f32 %v1814_v28  ;;  %v1804_v44 = vsub.f32 %v1772_v19, %v1794_v43 }
 0x6c2   : > { %v1818_v53 = vmul.f32 1.442695, %v1804_v44 }
 0x6c3   : > { %v1868_v54 = vpop.permute.xlu0 %1867 }
 0x6c4   : > { %4489 = vpow2.f32 %v1818_v53  ;;  %4039 = vmatpush3.bf16.msra.mxu0 %v1868_v54 }
 0x6c5   : > { %v4482_v58 = vpop.eup %4481  ;;  %4050 = vmatprep.subr.bf16.mxu0 %v5753_v55 }
 0x6c6   : > { %v1828_v18 = vsel %vm1285_vm2, %v4482_v58, 0.0 }
 0x6c7   : > { %1829 = vadd.xlane.f32.xlu0 %v1828_v18 }
 0x6c9   : > { %v4484_v62 = vpop.eup %4483 }
 0x6ca   : > { %v1831_v59 = vsel %vm1285_vm2, %v4484_v62, 0.0  ;;  %v4486_v36 = vpop.eup %4485 }
 0x6cb   : > { %1832 = vadd.xlane.f32.xlu1 %v1831_v59  ;;  %v1837_v19 = vsel %vm1285_vm2, %v4486_v36, 0.0 }
 0x6cd   : > { %v4488_v5 = vpop.eup %4487 }
 0x6ce   : > { %v1834_v3 = vsel %vm1285_vm2, %v4488_v5, 0.0 }
 0x6cf   : > { %1835 = vadd.xlane.f32.xlu0 %v1834_v3  ;;  %1838 = vadd.xlane.f32.xlu1 %v1837_v19 }
 0x6d1   : > { %v5339_v6 = vpop.eup %4489 }
 0x6d2   : > { %v1840_v8 = vsel %vm1285_vm2, %v5339_v6, 0.0 }
 0x6d3   : > { %1841 = vadd.xlane.f32.xlu0 %v1840_v8 }
 0x6e0   : > { %2111 = vrot.lane.b32.xlu1 %v5163_v12, %s4823_s23 }
 0x6e2   : > { %v1797_v7 = vpop.xlane.xlu1 %1796 }
 0x6e3   : > { %v1805_v61 = vsub.f32 %v5319_v20, %v1797_v7 }
 0x6e5   : > { %v1820_v40 = vmul.f32 1.442695, %v1805_v61 }
 0x6e6   : > { %v2012_v20 = vpop.permute.xlu1 %2011 }
 0x6e7   : > { %4491 = vpow2.f32 %v1820_v40 }
 0x6e9   : > { %2060 = vrot.lane.b32.xlu0 %v5152_v63, %s4823_s23 }
 0x6ed   : > { %2058 = vrot.lane.b32.xlu0 %v5161_v11, %s4823_s23 }
 0x6f1   : > { %2109 = vrot.lane.b32.xlu0 %v5172_v21, %s4823_s23 }
 0x6f4   : > { %v5354_v2 = vpop.eup %4491 }
 0x6f5   : > { %2160 = vrot.lane.b32.xlu0 %v5183_v14, %s4823_s23  ;;  %v1843_v23 = vsel %vm1285_vm2, %v5354_v2, 0.0 }
 0x704   : > { %1844 = vadd.xlane.f32.xlu1 %v1843_v23 }
 0x715   : > { %2162 = vrot.lane.b32.xlu1 %v5174_v22, %s4823_s23 }
 0x717   : > { %v1824_v17 = vpop.xlane.xlu0 %1823 }
 0x718   : > { %4493 = vrcp.f32 %v1824_v17 }
 0x719   : > { %2213 = vrot.lane.b32.xlu1 %v5185_v33, %s4823_s23 }
 0x71b   : > { %v1827_v30 = vpop.xlane.xlu1 %1826 }
 0x71c   : > { %4495 = vrcp.f32 %v1827_v30 }
 0x71d   : > { %2211 = vrot.lane.b32.xlu1 %v5198_v38, %s4823_s23 }
 0x725   : > { %v4494_v25 = vpop.eup %4493 }
 0x726   : > { %v1854_v43 = vmul.f32 %v4494_v25, %v5325_v56 }
 0x729   : > { %v4496_v28 = vpop.eup %4495 }
 0x72a   : > { %v1855_v44 = vmul.f32 %v4496_v28, %v5329_v60 }
 0x72c   : > { %v1862_v53 = vpack.c.bf16 %v1855_v44, %v1854_v43 }
 0x72e   : > { %4041 = vmatmul.mubr.msk.bf16.vlgmr.msra.gmra.mxu0 %vm1285_vm2, %v1862_v53 }
 0x72f   : > { %4051 = vmatpush3.bf16.msra.mxu0 %v1964_v57  ;;  %4052 = vmatprep.mubr.msk.bf16.mxu0 %vm4821_vm0, %v5753_v55 }
 0x730   : > { %4062 = vmatprep.subr.bf16.mxu0 %v5753_v55 }
 0x750   : > { %v1830_v54 = vpop.xlane.xlu0 %1829 }
 0x751   : > { %4497 = vrcp.f32 %v1830_v54 }
 0x754   : > { %v1833_v18 = vpop.xlane.xlu1 %1832 }
 0x755   : > { %4499 = vrcp.f32 %v1833_v18 }
 0x758   : > { %v1836_v59 = vpop.xlane.xlu0 %1835  ;;  %v1839_v3 = vpop.xlane.xlu1 %1838 }
 0x759   : > { %4501 = vrcp.f32 %v1836_v59 }
 0x75a   : > { %4503 = vrcp.f32 %v1839_v3 }
 0x75c   : > { %v1842_v60 = vpop.xlane.xlu0 %1841 }
 0x75d   : > { %4505 = vrcp.f32 %v1842_v60 }
 0x75e   : > { %v4498_v56 = vpop.eup %4497 }
 0x75f   : > { %v1856_v8 = vmul.f32 %v4498_v56, %v4482_v58 }
 0x760   : > { %v2061_v30 = vpop.permute.xlu0 %2060 }
 0x761   : > { %v2066_v28 = vsel %vm1088_vm1, %v2061_v30, 0 }
 0x762   : > { %v4500_v19 = vpop.eup %4499 }
 0x763   : > { %v1857_v7 = vmul.f32 %v4500_v19, %v4484_v62  ;;  %v2112_v62 = vpop.permute.xlu1 %2111 }
 0x764   : > { %v2059_v58 = vpop.permute.xlu0 %2058  ;;  %v2117_v56 = vsel %vm1088_vm1, %v2112_v62, 0 }
 0x765   : > { %v1863_v61 = vpack.c.bf16 %v1857_v7, %v1856_v8 }
 0x766   : > { %v4502_v57 = vpop.eup %4501 }
 0x767   : > { %v4504_v40 = vpop.eup %4503  ;;  %4047 = vmatmul.mubr.msk.bf16.vlgmr.msra.gmra.mxu1 %vm1285_vm2, %v1863_v61  ;;  %v1858_v23 = vmul.f32 %v4502_v57, %v4488_v5 }
 0x768   : > { %4057 = vmatpush3.bf16.msra.mxu1 %v2012_v20  ;;  %v1859_v17 = vmul.f32 %v4504_v40, %v4486_v36  ;;  %4058 = vmatprep.mubr.msk.bf16.mxu1 %vm4821_vm0, %v5753_v55  ;;  %v2110_v43 = vpop.permute.xlu0 %2109 }
 0x769   : > { %4068 = vmatprep.subr.bf16.mxu1 %v5753_v55 }
 0x76a   : > { %v1864_v25 = vpack.c.bf16 %v1859_v17, %v1858_v23  ;;  %v4506_v44 = vpop.eup %4505 }
 0x76b   : > { %v1860_v18 = vmul.f32 %v4506_v44, %v5339_v6 }
 0x76c   : > { %4053 = vmatmul.mubr.msk.bf16.vlgmr.msra.gmra.mxu0 %vm1285_vm2, %v1864_v25  ;;  %v2161_v53 = vpop.permute.xlu0 %2160 }
 0x76d   : > { %4063 = vmatpush3.bf16.xpose.msra.mxu0 %v2066_v28  ;;  %4064 = vmatprep.mubr.msk.bf16.mxu0 %vm4821_vm0, %v5753_v55 }
 0x76e   : > { %4074 = vmatprep.subr.bf16.mxu0 %v5753_v55 }
 0x774   : > { %4065 = vmatmul.mubr.msk.bf16.vlgmr.msra.gmra.mxu0 %vm1088_vm1, %v2059_v58 }
 0x775   : > { %4076 = vmatprep.mubr.msk.bf16.mxu0 %vm4821_vm0, %v5753_v55 }
 0x78d   : > { %v1845_v36 = vpop.xlane.xlu1 %1844 }
 0x78e   : > { %4507 = vrcp.f32 %v1845_v36 }
 0x791   : > { %v2163_v5 = vpop.permute.xlu1 %2162 }
 0x792   : > { %v2168_v20 = vsel %vm1088_vm1, %v2163_v5, 0 }
 0x793   : > { %4075 = vmatpush3.bf16.xpose.msra.mxu0 %v2168_v20 }
 0x794   : > { %4086 = vmatprep.subr.bf16.mxu0 %v5753_v55 }
 0x795   : > { %v2214_v19 = vpop.permute.xlu1 %2213 }
 0x796   : > { %v2219_v60 = vsel %vm1088_vm1, %v2214_v19, 0 }
 0x799   : > { %v2212_v6 = vpop.permute.xlu1 %2211 }
 0x79a   : > { %4077 = vmatmul.mubr.msk.bf16.vlgmr.msra.gmra.mxu0 %vm1088_vm1, %v2161_v53 }
 0x79b   : > { %v4508_v54 = vpop.eup %4507  ;;  %4088 = vmatprep.mubr.msk.bf16.mxu0 %vm4821_vm0, %v5753_v55 }
 0x79c   : > { %v1861_v59 = vmul.f32 %v4508_v54, %v5354_v2 }
 0x79e   : > { %v1865_v3 = vpack.c.bf16 %v1861_v59, %v1860_v18 }
 0x7a0   : > { %4059 = vmatmul.mubr.msk.bf16.vlgmr.msra.gmra.mxu1 %vm1285_vm2, %v1865_v3 }
 0x7a1   : > { %4069 = vmatpush3.bf16.xpose.msra.mxu1 %v2117_v56  ;;  %4070 = vmatprep.mubr.msk.bf16.mxu1 %vm4821_vm0, %v5753_v55 }
 0x7a2   : > { %4080 = vmatprep.subr.bf16.mxu1 %v5753_v55 }
 0x7a8   : > { %4071 = vmatmul.mubr.msk.bf16.vlgmr.msra.gmra.mxu1 %vm1088_vm1, %v2110_v43 }
 0x7a9   : > { %4081 = vmatpush3.bf16.xpose.msra.mxu1 %v2219_v60  ;;  %4082 = vmatprep.mubr.msk.bf16.mxu1 %vm4821_vm0, %v5753_v55 }
 0x7aa   : > { %4092 = vmatprep.subr.bf16.mxu1 %v5753_v55 }
 0x7b0   : > { %4083 = vmatmul.mubr.msk.bf16.vlgmr.msra.gmra.mxu1 %vm1088_vm1, %v2212_v6 }
 0x7b1   : > { %4094 = vmatprep.mubr.msk.bf16.mxu1 %vm4821_vm0, %v5753_v55 }
 0x7ee   : > { %v5402_v2 = vpop.f32.mrf.mxu0 }
 0x7f0   : > { %v4042_v8 = vpop.f32.mrf.mxu0 }
 0x7f2   : > { %v5404_v7 = vpop.f32.mrf.mxu0 }
 0x7f3   : > { %v4313_v61 = vpack.i.bf16 %v5404_v7, %v5402_v2 }
 0x7f4   : > { %v4043_v57 = vpop.f32.mrf.mxu0 }
 0x827   : > { %v5408_v40 = vpop.f32.mrf.mxu1 }
 0x829   : > { %v4048_v23 = vpop.f32.mrf.mxu1 }
 0x82b   : > { %v5410_v17 = vpop.f32.mrf.mxu1 }
 0x82c   : > { %v4318_v30 = vpack.i.bf16 %v5410_v17, %v5408_v40  ;;  %v5414_v25 = vpop.f32.mrf.mxu0 }
 0x82d   : > { %v4049_v28 = vpop.f32.mrf.mxu1 }
 0x82e   : > { %v4054_v58 = vpop.f32.mrf.mxu0 }
 0x830   : > { %v5416_v62 = vpop.f32.mrf.mxu0 }
 0x831   : > { %v4333_v36 = vpack.i.bf16 %v5416_v62, %v5414_v25 }
 0x832   : > { %v4055_v5 = vpop.f32.mrf.mxu0 }
 0x834   : > { %v2102_v20 = vpop.f32.mrf.mxu0 }
 0x835   : > { %v2262_v43 = vmul.f32 0.17677669, %v2102_v20 }
 0x836   : > { %v4066_v44 = vpop.f32.mrf.mxu0 }
 0x837   : > { %v2270_v53 = vsel %vm1285_vm2, %v2262_v43, -inf }
 0x838   : > { %2271 = vmax.xlane.f32.xlu0 %v2270_v53  ;;  %v2105_v54 = vpop.f32.mrf.mxu0 }
 0x839   : > { %v2263_v18 = vmul.f32 0.17677669, %v2105_v54 }
 0x83a   : > { %v4067_v59 = vpop.f32.mrf.mxu0 }
 0x83b   : > { %v2273_v3 = vsel %vm1285_vm2, %v2263_v18, -inf }
 0x83c   : > { %2274 = vmax.xlane.f32.xlu1 %v2273_v3 }
 0x85a   : > { %v2204_v56 = vpop.f32.mrf.mxu0 }
 0x85c   : > { %v4078_v19 = vpop.f32.mrf.mxu0 }
 0x85e   : > { %v2207_v60 = vpop.f32.mrf.mxu0 }
 0x85f   : > { %v2267_v6 = vmul.f32 0.17677669, %v2207_v60 }
 0x860   : > { %v5422_v8 = vpop.f32.mrf.mxu1  ;;  %v4079_v57 = vpop.f32.mrf.mxu0 }
 0x861   : > { %v2285_v23 = vsel %vm1285_vm2, %v2267_v6, -inf  ;;  %v2266_v57 = vmul.f32 0.17677669, %v2204_v56 }
 0x862   : > { %2286 = vmax.xlane.f32.xlu1 %v2285_v23  ;;  %v4060_v28 = vpop.f32.mrf.mxu1 }
 0x864   : > { %v5425_v58 = vpop.f32.mrf.mxu1 }
 0x865   : > { %v5781_v2 = vpack.i.bf16 %v5425_v58, %v5422_v8  ;;  %v5782_v58 = vmov 0.0  }
 0x866   : > { %v4061_v20 = vpop.f32.mrf.mxu1 }
 0x867   : > { %v2282_v20 = vsel %vm1285_vm2, %v2266_v57, -inf }
 0x868   : > { %v2153_v44 = vpop.f32.mrf.mxu1 }
 0x869   : > { %v2264_v53 = vmul.f32 0.17677669, %v2153_v44 }
 0x86a   : > { %v4072_v54 = vpop.f32.mrf.mxu1 }
 0x86b   : > { %v2276_v59 = vsel %vm1285_vm2, %v2264_v53, -inf }
 0x86c   : > { %2277 = vmax.xlane.f32.xlu0 %v2276_v59  ;;  %v2156_v3 = vpop.f32.mrf.mxu1 }
 0x86d   : > { %v2265_v19 = vmul.f32 0.17677669, %v2156_v3 }
 0x86e   : > { %v4073_v60 = vpop.f32.mrf.mxu1 }
 0x86f   : > { %v2279_v51 = vsel %vm1285_vm2, %v2265_v19, -inf }
 0x870   : > { %2280 = vmax.xlane.f32.xlu0 %v2279_v51  ;;  %v2255_v23 = vpop.f32.mrf.mxu1 }
 0x871   : > { %v2268_v52 = vmul.f32 0.17677669, %v2255_v23 }
 0x872   : > { %v4084_v28 = vpop.f32.mrf.mxu1 }
 0x873   : > { %2409 = vrot.lane.b32.xlu1 %v5200_v39, %s4823_s23  ;;  %v2288_v59 = vsel %vm1285_vm2, %v2268_v52, -inf }
 0x874   : > { %2283 = vmax.xlane.f32.xlu0 %v2282_v20  ;;  %v2258_v44 = vpop.f32.mrf.mxu1 }
 0x875   : > { %v5439_v51 = vmul.f32 0.17677669, %v2258_v44 }
 0x876   : > { %v4085_v54 = vpop.f32.mrf.mxu1 }
 0x877   : > { %2456 = vrot.lane.b32.xlu1 %v5250_v16, %s4823_s23  ;;  %v2291_v56 = vsel %vm1285_vm2, %v5439_v51, -inf }
 0x878   : > { %2289 = vmax.xlane.f32.xlu0 %v2288_v59 }
 0x88e   : > { %2362 = vrot.lane.b32.xlu0 %v5187_v35, %s4823_s23 }
 0x89b   : > { %2292 = vmax.xlane.f32.xlu1 %v2291_v56 }
 0x8ac   : > { %2503 = vrot.lane.b32.xlu1 %v5159_v9, %s4823_s23 }
 0x8c1   : > { %v2272_v3 = vpop.xlane.xlu0 %2271 }
 0x8c2   : > { %v2294_v60 = vsub.f32 %v2262_v43, %v2272_v3 }
 0x8c4   : > { %v2302_v23 = vmul.f32 1.442695, %v2294_v60 }
 0x8c5   : > { %v2275_v28 = vpop.xlane.xlu1 %2274 }
 0x8c6   : > { %4509 = vpow2.f32 %v2302_v23  ;;  %v2295_v20 = vsub.f32 %v2263_v18, %v2275_v28 }
 0x8c8   : > { %v2304_v54 = vmul.f32 1.442695, %v2295_v20 }
 0x8ca   : > { %4511 = vpow2.f32 %v2304_v54 }
 0x8d3   : > { %v5445_v59 = vpop.eup %4509 }
 0x8d4   : > { %v2318_v44 = vsel %vm1285_vm2, %v5445_v59, 0.0 }
 0x8d5   : > { %2319 = vadd.xlane.f32.xlu0 %v2318_v44 }
 0x8d7   : > { %v5449_v15 = vpop.eup %4511 }
 0x8d8   : > { %v2321_v56 = vsel %vm1285_vm2, %v5449_v15, 0.0 }
 0x8d9   : > { %2322 = vadd.xlane.f32.xlu1 %v2321_v56 }
 0x8eb   : > { %v2287_v50 = vpop.xlane.xlu1 %2286 }
 0x8ec   : > { %v2299_v60 = vsub.f32 %v2267_v6, %v2287_v50 }
 0x8ee   : > { %v2312_v54 = vmul.f32 1.442695, %v2299_v60 }
 0x8ef   : > { %v2410_v43 = vpop.permute.xlu1 %2409 }
 0x8f0   : > { %4093 = vmatpush3.bf16.msra.mxu1 %v2410_v43 }
 0x8f1   : > { %4104 = vmatprep.subr.bf16.mxu1 %v5753_v55 }
 0x8f5   : > { %v2278_v18 = vpop.xlane.xlu0 %2277 }
 0x8f6   : > { %v2296_v3 = vsub.f32 %v2264_v53, %v2278_v18 }
 0x8f8   : > { %v2306_v23 = vmul.f32 1.442695, %v2296_v3 }
 0x8f9   : > { %v2281_v28 = vpop.xlane.xlu0 %2280 }
 0x8fa   : > { %4513 = vpow2.f32 %v2306_v23  ;;  %v2297_v20 = vsub.f32 %v2265_v19, %v2281_v28 }
 0x8fc   : > { %v2308_v44 = vmul.f32 1.442695, %v2297_v20 }
 0x8fd   : > { %v2284_v4 = vpop.xlane.xlu0 %2283 }
 0x8fe   : > { %4515 = vpow2.f32 %v2308_v44  ;;  %v2298_v37 = vsub.f32 %v2266_v57, %v2284_v4 }
 0x8ff   : > { %4517 = vpow2.f32 %v2312_v54 }
 0x900   : > { %v2310_v32 = vmul.f32 1.442695, %v2298_v37 }
 0x901   : > { %v2290_v56 = vpop.xlane.xlu0 %2289 }
 0x902   : > { %4519 = vpow2.f32 %v2310_v32  ;;  %v2300_v34 = vsub.f32 %v2268_v52, %v2290_v56 }
 0x904   : > { %v2314_v43 = vmul.f32 1.442695, %v2300_v34 }
 0x905   : > { %v2363_v5 = vpop.permute.xlu0 %2362 }
 0x906   : > { %4521 = vpow2.f32 %v2314_v43  ;;  %4087 = vmatpush3.bf16.msra.mxu0 %v2363_v5  ;;  %v2457_v5 = vpop.permute.xlu1 %2456 }
 0x907   : > { %v4514_v53 = vpop.eup %4513  ;;  %4098 = vmatprep.subr.bf16.mxu0 %v5753_v55 }
 0x908   : > { %v2324_v50 = vsel %vm1285_vm2, %v4514_v53, 0.0 }
 0x909   : > { %2325 = vadd.xlane.f32.xlu0 %v2324_v50 }
 0x90b   : > { %v4516_v6 = vpop.eup %4515 }
 0x90c   : > { %v2327_v19 = vsel %vm1285_vm2, %v4516_v6, 0.0  ;;  %v4518_v18 = vpop.eup %4517 }
 0x90d   : > { %2328 = vadd.xlane.f32.xlu1 %v2327_v19  ;;  %v2333_v32 = vsel %vm1285_vm2, %v4518_v18, 0.0 }
 0x90f   : > { %v4520_v4 = vpop.eup %4519 }
 0x910   : > { %v2330_v37 = vsel %vm1285_vm2, %v4520_v4, 0.0 }
 0x911   : > { %2331 = vadd.xlane.f32.xlu0 %v2330_v37  ;;  %2334 = vadd.xlane.f32.xlu1 %v2333_v32 }
 0x913   : > { %v5459_v34 = vpop.eup %4521 }
 0x914   : > { %v2336_v52 = vsel %vm1285_vm2, %v5459_v34, 0.0 }
 0x915   : > { %2337 = vadd.xlane.f32.xlu0 %v2336_v52 }
 0x922   : > { %2603 = vrot.lane.b32.xlu1 %v5163_v12, %s4824_s22 }
 0x924   : > { %v2293_v57 = vpop.xlane.xlu1 %2292 }
 0x925   : > { %v2301_v3 = vsub.f32 %v5439_v51, %v2293_v57 }
 0x927   : > { %v2316_v60 = vmul.f32 1.442695, %v2301_v3 }
 0x929   : > { %4523 = vpow2.f32 %v2316_v60 }
 0x92b   : > { %2552 = vrot.lane.b32.xlu0 %v5152_v63, %s4824_s22  ;;  %v2504_v63 = vpop.permute.xlu1 %2503 }
 0x92f   : > { %2550 = vrot.lane.b32.xlu0 %v5161_v11, %s4824_s22 }
 0x933   : > { %2601 = vrot.lane.b32.xlu0 %v5172_v21, %s4824_s22 }
 0x936   : > { %v5474_v23 = vpop.eup %4523 }
 0x937   : > { %2652 = vrot.lane.b32.xlu0 %v5183_v14, %s4824_s22  ;;  %v2339_v12 = vsel %vm1285_vm2, %v5474_v23, 0.0 }
 0x946   : > { %2340 = vadd.xlane.f32.xlu1 %v2339_v12 }
 0x957   : > { %2654 = vrot.lane.b32.xlu1 %v5174_v22, %s4824_s22 }
 0x95b   : > { %2705 = vrot.lane.b32.xlu1 %v5185_v33, %s4824_s22 }
 0x95e   : > { %v2320_v11 = vpop.xlane.xlu0 %2319 }
 0x95f   : > { %2703 = vrot.lane.b32.xlu1 %v5198_v38, %s4824_s22  ;;  %4525 = vrcp.f32 %v2320_v11 }
 0x962   : > { %v2323_v21 = vpop.xlane.xlu1 %2322 }
 0x963   : > { %4527 = vrcp.f32 %v2323_v21 }
 0x96c   : > { %v4526_v14 = vpop.eup %4525 }
 0x96d   : > { %v2350_v28 = vmul.f32 %v4526_v14, %v5445_v59 }
 0x970   : > { %v4528_v51 = vpop.eup %4527 }
 0x971   : > { %v2351_v20 = vmul.f32 %v4528_v51, %v5449_v15 }
 0x973   : > { %v2358_v54 = vpack.c.bf16 %v2351_v20, %v2350_v28 }
 0x975   : > { %4089 = vmatmul.mubr.msk.bf16.vlgmr.msra.gmra.mxu0 %vm1285_vm2, %v2358_v54 }
 0x976   : > { %4099 = vmatpush3.bf16.msra.mxu0 %v2457_v5  ;;  %4100 = vmatprep.mubr.msk.bf16.mxu0 %vm4821_vm0, %v5753_v55 }
 0x977   : > { %4110 = vmatprep.subr.bf16.mxu0 %v5753_v55 }
 0x992   : > { %v2326_v22 = vpop.xlane.xlu0 %2325 }
 0x993   : > { %4529 = vrcp.f32 %v2326_v22 }
 0x996   : > { %v2329_v33 = vpop.xlane.xlu1 %2328 }
 0x997   : > { %4531 = vrcp.f32 %v2329_v33 }
 0x99a   : > { %v2332_v38 = vpop.xlane.xlu0 %2331  ;;  %v2335_v44 = vpop.xlane.xlu1 %2334 }
 0x99b   : > { %4533 = vrcp.f32 %v2332_v38 }
 0x99c   : > { %4535 = vrcp.f32 %v2335_v44 }
 0x99e   : > { %v2338_v15 = vpop.xlane.xlu0 %2337 }
 0x99f   : > { %4537 = vrcp.f32 %v2338_v15 }
 0x9a0   : > { %v4530_v59 = vpop.eup %4529 }
 0x9a1   : > { %v2352_v43 = vmul.f32 %v4530_v59, %v4514_v53 }
 0x9a2   : > { %v2553_v57 = vpop.permute.xlu0 %2552 }
 0x9a3   : > { %v2558_v60 = vsel %vm1088_vm1, %v2553_v57, 0 }
 0x9a4   : > { %v4532_v56 = vpop.eup %4531 }
 0x9a5   : > { %v2353_v50 = vmul.f32 %v4532_v56, %v4516_v6  ;;  %v2604_v6 = vpop.permute.xlu1 %2603 }
 0x9a6   : > { %v2551_v53 = vpop.permute.xlu0 %2550  ;;  %v2609_v54 = vsel %vm1088_vm1, %v2604_v6, 0 }
 0x9a7   : > { %v2359_v19 = vpack.c.bf16 %v2353_v50, %v2352_v43 }
 0x9a8   : > { %v4534_v37 = vpop.eup %4533 }
 0x9a9   : > { %v4536_v32 = vpop.eup %4535  ;;  %4095 = vmatmul.mubr.msk.bf16.vlgmr.msra.gmra.mxu1 %vm1285_vm2, %v2359_v19  ;;  %v2354_v52 = vmul.f32 %v4534_v37, %v4520_v4 }
 0x9aa   : > { %4105 = vmatpush3.bf16.msra.mxu1 %v2504_v63  ;;  %v2355_v5 = vmul.f32 %v4536_v32, %v4518_v18  ;;  %4106 = vmatprep.mubr.msk.bf16.mxu1 %vm4821_vm0, %v5753_v55  ;;  %v2602_v63 = vpop.permute.xlu0 %2601 }
 0x9ab   : > { %4116 = vmatprep.subr.bf16.mxu1 %v5753_v55 }
 0x9ac   : > { %v2360_v3 = vpack.c.bf16 %v2355_v5, %v2354_v52  ;;  %v4538_v11 = vpop.eup %4537 }
 0x9ad   : > { %v2356_v51 = vmul.f32 %v4538_v11, %v5459_v34 }
 0x9ae   : > { %4101 = vmatmul.mubr.msk.bf16.vlgmr.msra.gmra.mxu0 %vm1285_vm2, %v2360_v3  ;;  %v2653_v21 = vpop.permute.xlu0 %2652 }
 0x9af   : > { %4111 = vmatpush3.bf16.xpose.msra.mxu0 %v2558_v60  ;;  %4112 = vmatprep.mubr.msk.bf16.mxu0 %vm4821_vm0, %v5753_v55 }
 0x9b0   : > { %4122 = vmatprep.subr.bf16.mxu0 %v5753_v55 }
 0x9b6   : > { %4113 = vmatmul.mubr.msk.bf16.vlgmr.msra.gmra.mxu0 %vm1088_vm1, %v2551_v53 }
 0x9b7   : > { %4124 = vmatprep.mubr.msk.bf16.mxu0 %vm4821_vm0, %v5753_v55 }
 0x9cf   : > { %v2341_v18 = vpop.xlane.xlu1 %2340 }
 0x9d0   : > { %4539 = vrcp.f32 %v2341_v18 }
 0x9d3   : > { %v2655_v4 = vpop.permute.xlu1 %2654 }
 0x9d4   : > { %v2660_v12 = vsel %vm1088_vm1, %v2655_v4, 0 }
 0x9d5   : > { %4123 = vmatpush3.bf16.xpose.msra.mxu0 %v2660_v12 }
 0x9d6   : > { %4134 = vmatprep.subr.bf16.mxu0 %v5753_v55 }
 0x9d7   : > { %v2706_v22 = vpop.permute.xlu1 %2705 }
 0x9d8   : > { %v2711_v33 = vsel %vm1088_vm1, %v2706_v22, 0 }
 0x9db   : > { %v2704_v34 = vpop.permute.xlu1 %2703 }
 0x9dc   : > { %4125 = vmatmul.mubr.msk.bf16.vlgmr.msra.gmra.mxu0 %vm1088_vm1, %v2653_v21 }
 0x9dd   : > { %v4540_v14 = vpop.eup %4539  ;;  %4136 = vmatprep.mubr.msk.bf16.mxu0 %vm4821_vm0, %v5753_v55 }
 0x9de   : > { %v2357_v28 = vmul.f32 %v4540_v14, %v5474_v23 }
 0x9e0   : > { %v2361_v20 = vpack.c.bf16 %v2357_v28, %v2356_v51 }
 0x9e2   : > { %4107 = vmatmul.mubr.msk.bf16.vlgmr.msra.gmra.mxu1 %vm1285_vm2, %v2361_v20 }
 0x9e3   : > { %4117 = vmatpush3.bf16.xpose.msra.mxu1 %v2609_v54  ;;  %4118 = vmatprep.mubr.msk.bf16.mxu1 %vm4821_vm0, %v5753_v55 }
 0x9e4   : > { %4128 = vmatprep.subr.bf16.mxu1 %v5753_v55 }
 0x9ea   : > { %4119 = vmatmul.mubr.msk.bf16.vlgmr.msra.gmra.mxu1 %vm1088_vm1, %v2602_v63 }
 0x9eb   : > { %4129 = vmatpush3.bf16.xpose.msra.mxu1 %v2711_v33  ;;  %4130 = vmatprep.mubr.msk.bf16.mxu1 %vm4821_vm0, %v5753_v55 }
 0x9ec   : > { %4140 = vmatprep.subr.bf16.mxu1 %v5753_v55 }
 0x9f2   : > { %4131 = vmatmul.mubr.msk.bf16.vlgmr.msra.gmra.mxu1 %vm1088_vm1, %v2704_v34 }
 0x9f3   : > { %4142 = vmatprep.mubr.msk.bf16.mxu1 %vm4821_vm0, %v5753_v55 }
 0xa35   : > { %v5522_v23 = vpop.f32.mrf.mxu0 }
 0xa37   : > { %v4090_v38 = vpop.f32.mrf.mxu0 }
 0xa39   : > { %v5524_v44 = vpop.f32.mrf.mxu0 }
 0xa3a   : > { %v4323_v59 = vpack.i.bf16 %v5524_v44, %v5522_v23 }
 0xa3b   : > { %v4091_v56 = vpop.f32.mrf.mxu0 }
 0xa69   : > { %v5528_v15 = vpop.f32.mrf.mxu1 }
 0xa6b   : > { %v4096_v43 = vpop.f32.mrf.mxu1 }
 0xa6d   : > { %v5530_v50 = vpop.f32.mrf.mxu1 }
 0xa6e   : > { %v5534_v37 = vpop.f32.mrf.mxu0 }
 0xa6f   : > { %v4097_v32 = vpop.f32.mrf.mxu1 }
 0xa70   : > { %v4102_v52 = vpop.f32.mrf.mxu0 }
 0xa72   : > { %v5536_v5 = vpop.f32.mrf.mxu0 }
 0xa74   : > { %v4103_v3 = vpop.f32.mrf.mxu0 }
 0xa76   : > { %v2594_v60 = vpop.f32.mrf.mxu0 }
 0xa77   : > { %v2754_v53 = vmul.f32 0.17677669, %v2594_v60 }
 0xa78   : > { %v4114_v6 = vpop.f32.mrf.mxu0 }
 0xa79   : > { %v2762_v18 = vsel %vm1285_vm2, %v2754_v53, -inf }
 0xa7a   : > { %2763 = vmax.xlane.f32.xlu0 %v2762_v18  ;;  %v2597_v4 = vpop.f32.mrf.mxu0 }
 0xa7b   : > { %v2755_v12 = vmul.f32 0.17677669, %v2597_v4 }
 0xa7c   : > { %v4115_v63 = vpop.f32.mrf.mxu0 }
 0xa7d   : > { %v2765_v11 = vsel %vm1285_vm2, %v2755_v12, -inf }
 0xa7e   : > { %2766 = vmax.xlane.f32.xlu1 %v2765_v11 }
 0xa9c   : > { %v2696_v21 = vpop.f32.mrf.mxu0 }
 0xa9d   : > { %v2758_v4 = vmul.f32 0.17677669, %v2696_v21 }
 0xa9e   : > { %v4126_v14 = vpop.f32.mrf.mxu0 }
 0xaa0   : > { %v2699_v51 = vpop.f32.mrf.mxu0 }
 0xaa1   : > { %v2759_v28 = vmul.f32 0.17677669, %v2699_v51 }
 0xaa2   : > { %v5542_v20 = vpop.f32.mrf.mxu1  ;;  %v4127_v54 = vpop.f32.mrf.mxu0 }
 0xaa3   : > { %v2777_v22 = vsel %vm1285_vm2, %v2759_v28, -inf  ;;  %v2774_v54 = vsel %vm1285_vm2, %v2758_v4, -inf }
 0xaa4   : > { %2778 = vmax.xlane.f32.xlu1 %v2777_v22  ;;  %v4108_v33 = vpop.f32.mrf.mxu1 }
 0xaa6   : > { %v5545_v34 = vpop.f32.mrf.mxu1 }
 0xaa8   : > { %v4109_v56 = vpop.f32.mrf.mxu1 }
 0xaaa   : > { %v2645_v43 = vpop.f32.mrf.mxu1 }
 0xaab   : > { %v2756_v32 = vmul.f32 0.17677669, %v2645_v43 }
 0xaac   : > { %v4120_v52 = vpop.f32.mrf.mxu1 }
 0xaad   : > { %v2768_v3 = vsel %vm1285_vm2, %v2756_v32, -inf }
 0xaae   : > { %2769 = vmax.xlane.f32.xlu0 %v2768_v3  ;;  %v2648_v60 = vpop.f32.mrf.mxu1 }
 0xaaf   : > { %v2757_v6 = vmul.f32 0.17677669, %v2648_v60 }
 0xab0   : > { %v4121_v18 = vpop.f32.mrf.mxu1 }
 0xab1   : > { %v2771_v63 = vsel %vm1285_vm2, %v2757_v6, -inf }
 0xab2   : > { %2772 = vmax.xlane.f32.xlu0 %v2771_v63  ;;  %v2747_v11 = vpop.f32.mrf.mxu1 }
 0xab3   : > { %v2760_v51 = vmul.f32 0.17677669, %v2747_v11 }
 0xab4   : > { %v4132_v14 = vpop.f32.mrf.mxu1 }
 0xab5   : > { %v2780_v43 = vsel %vm1285_vm2, %v2760_v51, -inf }
 0xab6   : > { %2775 = vmax.xlane.f32.xlu0 %v2774_v54  ;;  %v2750_v22 = vpop.f32.mrf.mxu1 }
 0xab7   : > { %v2761_v33 = vmul.f32 0.17677669, %v2750_v22 }
 0xab8   : > { %v4133_v56 = vpop.f32.mrf.mxu1 }
 0xab9   : > { %v2783_v52 = vsel %vm1285_vm2, %v2761_v33, -inf }
 0xaba   : > { %2781 = vmax.xlane.f32.xlu0 %v2780_v43  ;;  %2784 = vmax.xlane.f32.xlu1 %v2783_v52 }
 0xb03   : > { %v2764_v3 = vpop.xlane.xlu0 %2763 }
 0xb04   : > { %v2786_v21 = vsub.f32 %v2754_v53, %v2764_v3 }
 0xb06   : > { %v2794_v60 = vmul.f32 1.442695, %v2786_v21 }
 0xb07   : > { %v2767_v18 = vpop.xlane.xlu1 %2766 }
 0xb08   : > { %4541 = vpow2.f32 %v2794_v60  ;;  %v2787_v63 = vsub.f32 %v2755_v12, %v2767_v18 }
 0xb0a   : > { %v2796_v14 = vmul.f32 1.442695, %v2787_v63 }
 0xb0c   : > { %4543 = vpow2.f32 %v2796_v14 }
 0xb15   : > { %v5554_v11 = vpop.eup %4541 }
 0xb16   : > { %v2810_v54 = vsel %vm1285_vm2, %v5554_v11, 0.0 }
 0xb17   : > { %2811 = vadd.xlane.f32.xlu0 %v2810_v54 }
 0xb19   : > { %v5558_v22 = vpop.eup %4543 }
 0xb1a   : > { %v2813_v56 = vsel %vm1285_vm2, %v5558_v22, 0.0 }
 0xb1b   : > { %2814 = vadd.xlane.f32.xlu1 %v2813_v56 }
 0xb2d   : > { %v2779_v43 = vpop.xlane.xlu1 %2778 }
 0xb2e   : > { %v2791_v3 = vsub.f32 %v2759_v28, %v2779_v43 }
 0xb30   : > { %v2804_v18 = vmul.f32 1.442695, %v2791_v3 }
 0xb37   : > { %v2770_v53 = vpop.xlane.xlu0 %2769 }
 0xb38   : > { %v2788_v52 = vsub.f32 %v2756_v32, %v2770_v53 }
 0xb3a   : > { %v2798_v21 = vmul.f32 1.442695, %v2788_v52 }
 0xb3b   : > { %v2773_v12 = vpop.xlane.xlu0 %2772 }
 0xb3c   : > { %4545 = vpow2.f32 %v2798_v21  ;;  %v2789_v60 = vsub.f32 %v2757_v6, %v2773_v12 }
 0xb3e   : > { %v2800_v63 = vmul.f32 1.442695, %v2789_v60 }
 0xb3f   : > { %v2776_v14 = vpop.xlane.xlu0 %2775 }
 0xb40   : > { %4547 = vpow2.f32 %v2800_v63  ;;  %v2790_v38 = vsub.f32 %v2758_v4, %v2776_v14 }
 0xb41   : > { %4549 = vpow2.f32 %v2804_v18 }
 0xb42   : > { %v2802_v54 = vmul.f32 1.442695, %v2790_v38 }
 0xb43   : > { %v2782_v57 = vpop.xlane.xlu0 %2781 }
 0xb44   : > { %4551 = vpow2.f32 %v2802_v54  ;;  %v2792_v55 = vsub.f32 %v2760_v51, %v2782_v57  ;;  %v2785_v57 = vpop.xlane.xlu1 %2784 }
 0xb45   : > { %v2793_v51 = vsub.f32 %v2761_v33, %v2785_v57  ;;  %v4428_v57 = vld [vmem:[#allocation10 + $0x20] sm:$0xff]  }
 0xb46   : > { %v2806_v19 = vmul.f32 1.442695, %v2792_v55 }
 0xb47   : > { %v2808_v52 = vmul.f32 1.442695, %v2793_v51  ;;  %v4429_v51 = vld [vmem:[#allocation10 + $0x18] sm:$0xff]  }
 0xb48   : > { %4553 = vpow2.f32 %v2806_v19 }
 0xb49   : > { %v4546_v56 = vpop.eup %4545  ;;  %4555 = vpow2.f32 %v2808_v52  ;;  %v4430_v52 = vld [vmem:[#allocation10 + $0x10] sm:$0xff]  }
 0xb4a   : > { %v2816_v32 = vsel %vm1285_vm2, %v4546_v56, 0.0 }
 0xb4b   : > { %2817 = vadd.xlane.f32.xlu0 %v2816_v32 }
 0xb4d   : > { %v4548_v28 = vpop.eup %4547 }
 0xb4e   : > { %v2819_v43 = vsel %vm1285_vm2, %v4548_v28, 0.0  ;;  %v5564_v6 = vpop.eup %4549 }
 0xb4f   : > { %2820 = vadd.xlane.f32.xlu1 %v2819_v43  ;;  %v2825_v38 = vsel %vm1285_vm2, %v5564_v6, 0.0 }
 0xb51   : > { %v4552_v53 = vpop.eup %4551 }
 0xb52   : > { %v2822_v4 = vsel %vm1285_vm2, %v4552_v53, 0.0 }
 0xb53   : > { %2823 = vadd.xlane.f32.xlu0 %v2822_v4  ;;  %2826 = vadd.xlane.f32.xlu1 %v2825_v38 }
 0xb55   : > { %v5569_v55 = vpop.eup %4553 }
 0xb56   : > { %v2828_v19 = vsel %vm1285_vm2, %v5569_v55, 0.0 }
 0xb57   : > { %2829 = vadd.xlane.f32.xlu0 %v2828_v19  ;;  %v4427_v19 = vld [vmem:[#allocation10 + $0x28] sm:$0xff]  }
 0xb64   : > { %2901 = vrot.lane.b32.xlu1 %v5200_v39, %s4824_s22 }
 0xb68   : > { %2948 = vrot.lane.b32.xlu1 %v5250_v16, %s4824_s22  ;;  %v5780_v16 = vpack.i.bf16 %v5530_v50, %v5528_v15 }
 0xb6d   : > { %2854 = vrot.lane.b32.xlu0 %v5187_v35, %s4824_s22  ;;  %v4556_v35 = vpop.eup %4555 }
 0xb6e   : > { %v2831_v39 = vsel %vm1285_vm2, %v4556_v35, 0.0 }
 0xb71   : > { %4314 = vrot.lane.b32.xlu0 %v4313_v61, %s4824_s22 }
 0xb75   : > { %4324 = vrot.lane.b32.xlu0 %v4323_v59, %s4823_s23 }
 0xb79   : > { %4334 = vrot.lane.b32.xlu0 %v4333_v36, %s4824_s22 }
 0xb8c   : > { %2832 = vadd.xlane.f32.xlu1 %v2831_v39 }
 0xb9d   : > { %2995 = vrot.lane.b32.xlu1 %v5159_v9, %s4824_s22 }
 0xba0   : > { %v2812_v61 = vpop.xlane.xlu0 %2811 }
 0xba1   : > { %4319 = vrot.lane.b32.xlu1 %v4318_v30, %s4824_s22 }
 0xba4   : > { %v2815_v7 = vpop.xlane.xlu1 %2814 }
 0xba5   : > { %4329 = vrot.lane.b32.xlu1 %v5780_v16, %s4823_s23  ;;  %4557 = vrcp.f32 %v2815_v7 }
 0xba6   : > { %4559 = vrcp.f32 %v2812_v61 }
 0xba9   : > { %4339 = vrot.lane.b32.xlu1 %v5781_v2, %s4824_s22  ;;  %s4735_s22 = sshll.u32 %s4825_s19, 4  ;;  %s4736_s22 = int_to_ptr.vmem [resolvable:$false] %s4735_s22 }
 0xbaa   : > { %s4737_s25 = scalar_lea.vmem %s4736_s22, 128  ;;  %p4738_p5 = scmp.lt.s32.totalorder %s3531_s1, %s4736_s22 }
 0xbb2   : > { %v4558_v30 = vpop.eup %4557 }
 0xbb3   : > { %v4560_v23 = vpop.eup %4559  ;;  %v2843_v8 = vmul.f32 %v4558_v30, %v5558_v22 }
 0xbb4   : > { %v2842_v15 = vmul.f32 %v4560_v23, %v5554_v11  ;;  %v5783_v23 = vpack.i.bf16 %v5536_v5, %v5534_v37 }
 0xbb6   : > { %v2850_v33 = vpack.c.bf16 %v2843_v8, %v2842_v15  ;;  %v4433_v15 = vld [vmem:[#allocation11 + $0x38] sm:$0xff]  }
 0xbd4   : > { %v2818_v9 = vpop.xlane.xlu0 %2817 }
 0xbd5   : > { %4561 = vrcp.f32 %v2818_v9 }
 0xbd8   : > { %v2821_v25 = vpop.xlane.xlu1 %2820 }
 0xbd9   : > { %4563 = vrcp.f32 %v2821_v25 }
 0xbdc   : > { %v2824_v40 = vpop.xlane.xlu0 %2823  ;;  %v2827_v17 = vpop.xlane.xlu1 %2826 }
 0xbdd   : > { %4565 = vrcp.f32 %v2824_v40 }
 0xbde   : > { %4567 = vrcp.f32 %v2827_v17 }
 0xbe0   : > { %v2830_v62 = vpop.xlane.xlu0 %2829  ;;  %v2902_v36 = vpop.permute.xlu1 %2901 }
 0xbe1   : > { %4141 = vmatpush3.bf16.msra.mxu1 %v2902_v36  ;;  %4569 = vrcp.f32 %v2830_v62 }
 0xbe2   : > { %4152 = vmatprep.subr.bf16.mxu1 %v5782_v58  ;;  %v4562_v44 = vpop.eup %4561 }
 0xbe3   : > { %v2844_v3 = vmul.f32 %v4562_v44, %v4546_v56 }
 0xbe4   : > { %v2855_v59 = vpop.permute.xlu0 %2854  ;;  %v2949_v12 = vpop.permute.xlu1 %2948 }
 0xbe5   : > { %4135 = vmatpush3.bf16.msra.mxu0 %v2855_v59  ;;  %v5784_v59 = vpack.i.bf16 %v5545_v34, %v5542_v20 }
 0xbe6   : > { %v4564_v50 = vpop.eup %4563  ;;  %4146 = vmatprep.subr.bf16.mxu0 %v5782_v58 }
 0xbe7   : > { %v2845_v21 = vmul.f32 %v4564_v50, %v4548_v28  ;;  %v4434_v50 = vld [vmem:[#allocation11 + $0x30] sm:$0xff]  }
 0xbe8   : > { %4137 = vmatmul.mubr.msk.bf16.vlgmr.msra.gmra.mxu0 %vm1285_vm2, %v2850_v33  ;;  %v4315_v20 = vpop.permute.xlu0 %4314 }
 0xbe9   : > { %4147 = vmatpush3.bf16.msra.mxu0 %v2949_v12  ;;  %v2851_v60 = vpack.c.bf16 %v2845_v21, %v2844_v3  ;;  %4148 = vmatprep.mubr.msk.bf16.mxu0 %vm4821_vm0, %v5782_v58  ;;  %v4435_v21 = vld [vmem:[#allocation11 + $0x28] sm:$0xff]  }
 0xbea   : > { %v4566_v22 = vpop.eup %4565 }
 0xbeb   : > { %v4568_v18 = vpop.eup %4567  ;;  %4143 = vmatmul.mubr.msk.bf16.vlgmr.msra.gmra.mxu1 %vm1285_vm2, %v2851_v60  ;;  %v2846_v11 = vmul.f32 %v4566_v22, %v4552_v53  ;;  %v4426_v53 = vld [vmem:[#allocation10 + $0x30] sm:$0xff]   ;;  %v4436_v60 = vld [vmem:[#allocation11 + $0x20] sm:$0xff]  }
 0xbec   : > { %v2847_v63 = vmul.f32 %v4568_v18, %v5564_v6  ;;  %4154 = vmatprep.mubr.msk.bf16.mxu1 %vm4821_vm0, %v5782_v58  ;;  %v4425_v6 = vld [vmem:[#allocation10 + $0x38] sm:$0xff]   ;;  %v4325_v22 = vpop.permute.xlu0 %4324 }
 0xbed   : > { %4158 = vmatprep.subr.bf16.mxu0 %v4425_v6 }
 0xbee   : > { %v2852_v14 = vpack.c.bf16 %v2847_v63, %v2846_v11  ;;  %v4570_v32 = vpop.eup %4569  ;;  %v4317_v11 = vunpack.i.h.bf16 %v4315_v20  ;;  %v4316_v63 = vunpack.i.l.bf16 %v4315_v20 }
 0xbef   : > { %v2848_v43 = vmul.f32 %v4570_v32, %v5569_v55  ;;  %v4431_v55 = vld [vmem:[#allocation10 + $0x8] sm:$0xff]  }
 0xbf0   : > { %4149 = vmatmul.mubr.msk.bf16.vlgmr.msra.gmra.mxu0 %vm1285_vm2, %v2852_v14  ;;  %v4335_v14 = vpop.permute.xlu0 %4334 }
 0xbf1   : > { %4159 = vmatpush3.bf16.msra.mxu0 %v4425_v6 }
 0xbf2   : > { %4160 = vmatprep.subr.bf16.mxu0 %v4426_v53 }
 0xbf5   : > { %4161 = vmatpush3.bf16.msra.mxu0 %v4426_v53 }
 0xbf6   : > { %4162 = vmatprep.subr.bf16.mxu0 %v4427_v19 }
 0xbf9   : > { %4163 = vmatpush3.bf16.msra.mxu0 %v4427_v19 }
 0xbfa   : > { %4164 = vmatprep.subr.bf16.mxu0 %v4428_v57 }
 0xbfd   : > { %4165 = vmatpush3.bf16.msra.mxu0 %v4428_v57 }
 0xbfe   : > { %4166 = vmatprep.subr.bf16.mxu0 %v4429_v51 }
 0xc01   : > { %4167 = vmatpush3.bf16.msra.mxu0 %v4429_v51 }
 0xc02   : > { %4168 = vmatprep.subr.bf16.mxu0 %v4430_v52 }
 0xc05   : > { %4169 = vmatpush3.bf16.msra.mxu0 %v4430_v52 }
 0xc06   : > { %4170 = vmatprep.subr.bf16.mxu0 %v4431_v55 }
 0xc09   : > { %4171 = vmatpush3.bf16.msra.mxu0 %v4431_v55 }
 0xc15   : > { %v2833_v54 = vpop.xlane.xlu1 %2832 }
 0xc16   : > { %4571 = vrcp.f32 %v2833_v54  ;;  %v4327_v54 = vunpack.i.h.bf16 %v4325_v22 }
 0xc19   : > { %v2996_v56 = vpop.permute.xlu1 %2995 }
 0xc1a   : > { %4153 = vmatpush3.bf16.msra.mxu1 %v2996_v56  ;;  %v4326_v56 = vunpack.i.l.bf16 %v4325_v22 }
 0xc1b   : > { %4182 = vmatprep.subr.bf16.mxu1 %v4433_v15 }
 0xc1d   : > { %v4320_v34 = vpop.permute.xlu1 %4319 }
 0xc1e   : > { %v4322_v32 = vunpack.i.h.bf16 %v4320_v34 }
 0xc21   : > { %v4330_v18 = vpop.permute.xlu1 %4329 }
 0xc22   : > { %v4332_v53 = vunpack.i.h.bf16 %v4330_v18  ;;  %v4331_v19 = vunpack.i.l.bf16 %v4330_v18 }
 0xc23   : > { %v4572_v28 = vpop.eup %4571 }
 0xc24   : > { %v2849_v4 = vmul.f32 %v4572_v28, %v4556_v35  ;;  %v4432_v35 = vld [vmem:[#allocation10] sm:$0xff]  }
 0xc25   : > { %4172 = vmatprep.subr.bf16.mxu0 %v4432_v35  ;;  %v4340_v28 = vpop.permute.xlu1 %4339 }
 0xc26   : > { %v2853_v38 = vpack.c.bf16 %v2849_v4, %v2848_v43  ;;  %4173 = vmatpush3.bf16.msra.mxu0 %v4432_v35  ;;  %v3139_v43 = vsel %vm1088_vm1, %v5292_v0, %v4317_v11  ;;  %v3138_v4 = vsel %vm1088_vm1, %v5290_v45, %v4316_v63  ;;  %v3141_v35 = vsel %vm1088_vm1, %v5296_v10, %v4322_v32 }
 0xc27   : > { %v3147_v52 = vsel %vm3146_vm3, %v3138_v4, %v4326_v56  ;;  %v3148_v55 = vsel %vm3146_vm3, %v3139_v43, %v4327_v54  ;;  %v4438_v43 = vld [vmem:[#allocation11 + $0x10] sm:$0xff]  }
 0xc28   : > { %4155 = vmatmul.mubr.msk.bf16.vlgmr.msra.gmra.mxu1 %vm1285_vm2, %v2853_v38  ;;  %v4321_v38 = vunpack.i.l.bf16 %v4320_v34 }
 0xc29   : > { %4183 = vmatpush3.bf16.msra.mxu1 %v4433_v15 }
 0xc2a   : > { %4184 = vmatprep.subr.bf16.mxu1 %v4434_v50  ;;  %v3140_v45 = vsel %vm1088_vm1, %v5294_v42, %v4321_v38  ;;  %v3746_v38 = vld [vmem:[%s5735_s7] ss:$0 sm:$0xff] }
 0xc2d   : > { %4185 = vmatpush3.bf16.msra.mxu1 %v4434_v50 }
 0xc2e   : > { %4186 = vmatprep.subr.bf16.mxu1 %v4435_v21 }
 0xc31   : > { %4187 = vmatpush3.bf16.msra.mxu1 %v4435_v21 }
 0xc32   : > { %4188 = vmatprep.subr.bf16.mxu1 %v4436_v60 }
 0xc35   : > { %4189 = vmatpush3.bf16.msra.mxu1 %v4436_v60  ;;  %v4341_v60 = vunpack.i.l.bf16 %v4340_v28 }
 0xc37   : > { %v3144_v22 = vsel %vm1088_vm1, %v5304_v41, %v4341_v60  ;;  %v4440_v41 = vld [vmem:[#allocation11] sm:$0xff]  }
 0xca8   : > { %v2894_v39 = vpop.f32.mrf.mxu0 }
 0xcaa   : > { %v4138_v16 = vpop.f32.mrf.mxu0 }
 0xcab   : > { %v2941_v2 = vpop.f32.mrf.mxu1 }
 0xcac   : > { %v2897_v7 = vpop.f32.mrf.mxu0 }
 0xcad   : > { %v4343_v61 = vpack.i.bf16 %v2897_v7, %v2894_v39  ;;  %v4144_v9 = vpop.f32.mrf.mxu1 }
 0xcae   : > { %v4139_v25 = vpop.f32.mrf.mxu0 }
 0xcaf   : > { %4344 = vrot.lane.b32.xlu0 %v4343_v61, %s4822_s12  ;;  %v2944_v40 = vpop.f32.mrf.mxu1  ;;  %v4337_v25 = vunpack.i.h.bf16 %v4335_v14 }
 0xcb0   : > { %v4353_v17 = vpack.i.bf16 %v2944_v40, %v2941_v2  ;;  %v2988_v30 = vpop.f32.mrf.mxu0  ;;  %v4336_v40 = vunpack.i.l.bf16 %v4335_v14 }
 0xcb1   : > { %v4145_v62 = vpop.f32.mrf.mxu1  ;;  %v3143_v42 = vsel %vm1088_vm1, %v5300_v13, %v4337_v25 }
 0xcb2   : > { %v4150_v36 = vpop.f32.mrf.mxu0  ;;  %4354 = vrot.lane.b32.xlu1 %v4353_v17, %s4822_s12  ;;  %v3149_v17 = vsel %vm3146_vm3, %v3140_v45, %v4331_v19  ;;  %v5787_v45 = vmax.f32 %v5106_v29, 0.0  ;;  %v5789_v29 = vmax.f32 %v5126_v46, 0.0 }
 0xcb3   : > { %4349 = vrot.lane.b32.xlu0 %v5783_v23, %s4823_s23 }
 0xcb4   : > { %v2991_v8 = vpop.f32.mrf.mxu0 }
 0xcb5   : > { %v4363_v58 = vpack.i.bf16 %v2991_v8, %v2988_v30  ;;  %v3150_v30 = vsel %vm3146_vm3, %v3141_v35, %v4332_v53 }
 0xcb6   : > { %v4151_v44 = vpop.f32.mrf.mxu0  ;;  %4359 = vrot.lane.b32.xlu1 %v5784_v59, %s4823_s23  ;;  %s4731_s23 = scalar_lea.vmem %s3531_s1, 64 }
 0xcb7   : > { %4364 = vrot.lane.b32.xlu0 %v4363_v58, %s4822_s12  ;;  %v3142_v44 = vsel %vm1088_vm1, %v5298_v1, %v4336_v40  ;;  %p4732_p10 = scmp.ne.s32.totalorder %s3531_s1, %s4731_s23  ;;  %p4739_p9 = scmp.lt.s32.totalorder %s4737_s25, %s4731_s23 }
 0xcb9   : > { %p4733_p0 = pnand %p4732_p10, %p5793_p11  ;;  %p4740_p1 = por %p4739_p9, %p4738_p5 }
 0xcbb   : > { %p4734_p13 = pneg %p4733_p0 }
 0xcbd   : > { %p4741_p3 = pnand %p4740_p1, %p4734_p13 }
 0xce8   : > { %v3035_v33 = vpop.f32.mrf.mxu1 }
 0xcea   : > { %v4156_v3 = vpop.f32.mrf.mxu1 }
 0xcec   : > { %v3038_v37 = vpop.f32.mrf.mxu1 }
 0xced   : > { %v4368_v5 = vpack.i.bf16 %v3038_v37, %v3035_v33 }
 0xcee   : > { %v4157_v12 = vpop.f32.mrf.mxu1 }
 0xcef   : > { %4369 = vrot.lane.b32.xlu1 %v4368_v5, %s4822_s12  ;;  %v4342_v12 = vunpack.i.h.bf16 %v4340_v28  ;;  %v4437_v28 = vld [vmem:[#allocation11 + $0x18] sm:$0xff]   ;;  %s3517_s12 = scalar_lea.sflag [#allocation4], %s5054_s5 }
 0xcf0   : > { %4190 = vmatprep.subr.bf16.mxu1 %v4437_v28 }
 0xcf1   : > { %v3145_v1 = vsel %vm1088_vm1, %v5307_v24, %v4342_v12  ;;  %4191 = vmatpush3.bf16.msra.mxu1 %v4437_v28  ;;  %v4439_v24 = vld [vmem:[#allocation11 + $0x8] sm:$0xff]  }
 0xcf2   : > { %4192 = vmatprep.subr.bf16.mxu1 %v4438_v43 }
 0xcf5   : > { %4193 = vmatpush3.bf16.msra.mxu1 %v4438_v43 }
 0xcf6   : > { %4194 = vmatprep.subr.bf16.mxu1 %v4439_v24 }
 0xcf9   : > { %4195 = vmatpush3.bf16.msra.mxu1 %v4439_v24 }
 0xcfa   : > { %4196 = vmatprep.subr.bf16.mxu1 %v4440_v41 }
 0xcfd   : > { %4197 = vmatpush3.bf16.msra.mxu1 %v4440_v41 }
 0xd21   : > { %v4345_v6 = vpop.permute.xlu0 %4344 }
 0xd22   : > { %v4347_v57 = vunpack.i.h.bf16 %v4345_v6  ;;  %v4346_v51 = vunpack.i.l.bf16 %v4345_v6 }
 0xd24   : > { %v4355_v39 = vpop.permute.xlu1 %4354  ;;  %v3156_v0 = vsel %vm3155_vm4, %v3147_v52, %v4346_v51  ;;  %v3157_v16 = vsel %vm3155_vm4, %v3148_v55, %v4347_v57  ;;  %v5785_v55 = vmax.f32 %v5102_v26, 0.0 }
 0xd25   : > { %v4357_v2 = vunpack.i.h.bf16 %v4355_v39  ;;  %v4356_v7 = vunpack.i.l.bf16 %v4355_v39  ;;  %v4350_v61 = vpop.permute.xlu0 %4349  ;;  %v3164_v9 = vpack.c.bf16 %v3157_v16, %v3156_v0  ;;  %v5786_v39 = vmax.f32 %v5104_v27, 0.0 }
 0xd26   : > { %v4352_v36 = vunpack.i.h.bf16 %v4350_v61  ;;  %v4351_v23 = vunpack.i.l.bf16 %v4350_v61 }
 0xd27   : > { %v3159_v10 = vsel %vm3155_vm4, %v3150_v30, %v4357_v2  ;;  %v3158_v62 = vsel %vm3155_vm4, %v3149_v17, %v4356_v7  ;;  %4174 = vmatprep.mubr.bf16.mxu0 %v3164_v9  ;;  %v5788_v7 = vmax.f32 %v5108_v31, 0.0  ;;  %v5790_v31 = vmax.f32 %v5128_v47, 0.0 }
 0xd28   : > { %v3165_v8 = vpack.c.bf16 %v3159_v10, %v3158_v62  ;;  %v3152_v50 = vsel %vm3146_vm3, %v3143_v42, %v4352_v36  ;;  %v3151_v33 = vsel %vm3146_vm3, %v3142_v44, %v4351_v23  ;;  %v4360_v5 = vpop.permute.xlu1 %4359 }
 0xd29   : > { %v4365_v58 = vpop.permute.xlu0 %4364  ;;  %v4362_v13 = vunpack.i.h.bf16 %v4360_v5  ;;  %v4361_v20 = vunpack.i.l.bf16 %v4360_v5 }
 0xd2a   : > { %v4367_v59 = vunpack.i.h.bf16 %v4365_v58  ;;  %v4366_v15 = vunpack.i.l.bf16 %v4365_v58  ;;  %4175 = vmatmul.mubr.bf16.vlgmr.msra.gmra.mxu0 %v3165_v8 }
 0xd2b   : > { %v3154_v63 = vsel %vm3146_vm3, %v3145_v1, %v4362_v13  ;;  %v3153_v14 = vsel %vm3146_vm3, %v3144_v22, %v4361_v20 }
 0xd2c   : > { %v3160_v3 = vsel %vm3155_vm4, %v3151_v33, %v4366_v15  ;;  %v3161_v21 = vsel %vm3155_vm4, %v3152_v50, %v4367_v59  ;;  %v5791_v15 = vmax.f32 %v5130_v48, 0.0  ;;  %v5792_v33 = vmax.f32 %v5132_v49, 0.0  ;;  %v3755_v48 = vld [vmem:[%s5737_s9] ss:$0 sm:$0xff] }
 0xd2d   : > { %v3166_v37 = vpack.c.bf16 %v3161_v21, %v3160_v3 }
 0xd2f   : > { %4178 = vmatprep.mubr.bf16.mxu0 %v3166_v37 }
 0xd61   : > { %v4370_v34 = vpop.permute.xlu1 %4369 }
 0xd62   : > { %v4372_v18 = vunpack.i.h.bf16 %v4370_v34  ;;  %v4371_v11 = vunpack.i.l.bf16 %v4370_v34 }
 0xd64   : > { %v3162_v54 = vsel %vm3155_vm4, %v3153_v14, %v4371_v11  ;;  %v3163_v56 = vsel %vm3155_vm4, %v3154_v63, %v4372_v18 }
 0xd65   : > { %v3167_v32 = vpack.c.bf16 %v3163_v56, %v3162_v54 }
 0xd67   : > { %4179 = vmatmul.mubr.bf16.gmra.mxu0 %v3167_v32 }
 0xdea   : > { %v4176_v4 = vpop.f32.mrf.mxu0 }
 0xdeb   : > { %v3282_v19 = vadd.f32 %v4176_v4, %v3746_v38 }
 0xdec   : > { %v3273_v6 = vpop.f32.mrf.mxu0 }
 0xded   : > { %v3274_v53 = vadd.f32 %v3746_v38, %v3273_v6  ;;  %v3306_v2 = vadd.f32 %v3282_v19, %v5787_v45 }
 0xdee   : > { %v4177_v57 = vpop.f32.mrf.mxu0 }
 0xdef   : > { %v3285_v51 = vadd.f32 %v4177_v57, %v3746_v38  ;;  %v3304_v35 = vadd.f32 %v3274_v53, %v5785_v55  ;;  %v3314_v17 = vmax.f32 %v3306_v2, 0.0 }
 0xdf0   : > { %v3276_v52 = vpop.f32.mrf.mxu0 }
 0xdf1   : > { %v3307_v0 = vadd.f32 %v3285_v51, %v5786_v39  ;;  %v3277_v16 = vadd.f32 %v3746_v38, %v3276_v52  ;;  %v3312_v25 = vmax.f32 %v3304_v35, 0.0 }
 0xdf3   : > { %v3305_v61 = vadd.f32 %v3277_v16, %v5788_v7  ;;  %v3315_v9 = vmax.f32 %v3307_v0, 0.0 }
 0xdf5   : > { %v3313_v40 = vmax.f32 %v3305_v61, 0.0  ;;  %v3321_v10 = vpack.c.bf16 %v3315_v9, %v3314_v17 }
 0xdf7   : > { %v3320_v30 = vpack.c.bf16 %v3313_v40, %v3312_v25 }
 0xdf9   : > { %4198 = vmatprep.mubr.bf16.mxu1 %v3320_v30 }
 0xdfa   : > { %4199 = vmatmul.mubr.bf16.vlgmr.msra.gmra.mxu1 %v3321_v10 }
 0xe27   : > { %v4180_v26 = vpop.f32.mrf.mxu0 }
 0xe28   : > { %v3298_v27 = vadd.f32 %v4180_v26, %v3746_v38 }
 0xe29   : > { %v3289_v62 = vpop.f32.mrf.mxu0 }
 0xe2a   : > { %v3290_v36 = vadd.f32 %v3746_v38, %v3289_v62  ;;  %v3310_v50 = vadd.f32 %v3298_v27, %v5791_v15 }
 0xe2b   : > { %v4181_v23 = vpop.f32.mrf.mxu0 }
 0xe2c   : > { %v3301_v8 = vadd.f32 %v4181_v23, %v3746_v38  ;;  %v3308_v42 = vadd.f32 %v3290_v36, %v5789_v29  ;;  %v3318_v12 = vmax.f32 %v3310_v50, 0.0 }
 0xe2d   : > { %v3292_v58 = vpop.f32.mrf.mxu0 }
 0xe2e   : > { %v3311_v44 = vadd.f32 %v3301_v8, %v5790_v31  ;;  %v3293_v59 = vadd.f32 %v3746_v38, %v3292_v58  ;;  %v3316_v37 = vmax.f32 %v3308_v42, 0.0 }
 0xe30   : > { %v3309_v3 = vadd.f32 %v3293_v59, %v5792_v33  ;;  %v3319_v21 = vmax.f32 %v3311_v44, 0.0 }
 0xe32   : > { %v3317_v5 = vmax.f32 %v3309_v3, 0.0  ;;  %v3323_v13 = vpack.c.bf16 %v3319_v21, %v3318_v12 }
 0xe34   : > { %v3322_v60 = vpack.c.bf16 %v3317_v5, %v3316_v37 }
 0xe36   : > { %4202 = vmatprep.mubr.bf16.mxu1 %v3322_v60 }
 0xe37   : > { %4203 = vmatmul.mubr.bf16.gmra.mxu1 %v3323_v13 }
 0xeba   : > { %v4200_v46 = vpop.f32.mrf.mxu1 }
 0xebb   : > { %v3438_v18 = vadd.f32 %v4200_v46, %v3755_v48 }
 0xebc   : > { %v3429_v20 = vpop.f32.mrf.mxu1 }
 0xebd   : > { %v3430_v22 = vadd.f32 %v3755_v48, %v3429_v20  ;;  %v3462_v54 = vadd.f32 %v3438_v18, %v3314_v17 }
 0xebe   : > { %v4201_v34 = vpop.f32.mrf.mxu1 }
 0xebf   : > { %v3441_v49 = vadd.f32 %v4201_v34, %v3755_v48  ;;  %v3460_v63 = vadd.f32 %v3430_v22, %v3312_v25  ;;  %v3470_v43 = vmax.f32 %v3462_v54, 0.0 }
 0xec0   : > { %v3432_v47 = vpop.f32.mrf.mxu1 }
 0xec1   : > { %v3433_v1 = vadd.f32 %v3755_v48, %v3432_v47  ;;  %v3463_v14 = vadd.f32 %v3441_v49, %v3315_v9  ;;  %v3468_v32 = vmax.f32 %v3460_v63, 0.0 }
 0xec3   : > { %v3461_v11 = vadd.f32 %v3433_v1, %v3313_v40  ;;  %v3471_v28 = vmax.f32 %v3463_v14, 0.0 }
 0xec5   : > { %v3469_v56 = vmax.f32 %v3461_v11, 0.0  ;;  %v3483_v41 = vmax.f32 %v3470_v43, %v3471_v28 }
 0xec7   : > { %v3476_v24 = vmax.f32 %v3468_v32, %v3469_v56  ;;  %v3484_v57 = vrot.slane %v3483_v41, 4 }
 0xec9   : > { %v3477_v6 = vrot.slane %v3476_v24, 4  ;;  %v3485_v2 = vmax.f32 %v3483_v41, %v3484_v57 }
 0xecb   : > { %v3478_v35 = vmax.f32 %v3476_v24, %v3477_v6  ;;  %v3486_v10 = vrot.slane %v3485_v2, 2 }
 0xecd   : > { %v3479_v25 = vrot.slane %v3478_v35, 2  ;;  %v3487_v8 = vmax.f32 %v3485_v2, %v3486_v10 }
 0xecf   : > { %v3480_v36 = vmax.f32 %v3478_v35, %v3479_v25  ;;  %v3488_v59 = vrot.slane %v3487_v8, 1 }
 0xed1   : > { %v3481_v42 = vrot.slane %v3480_v36, 1 }
 0xed3   : > { %v3482_v50 = vmax.f32 %v3480_v36, %v3481_v42 }
 0xef7   : > { %v4204_v4 = vpop.f32.mrf.mxu1 }
 0xef8   : > { %v3454_v38 = vadd.f32 %v4204_v4, %v3755_v48 }
 0xef9   : > { %v3445_v53 = vpop.f32.mrf.mxu1 }
 0xefa   : > { %v3446_v19 = vadd.f32 %v3755_v48, %v3445_v53  ;;  %v3466_v52 = vadd.f32 %v3454_v38, %v3318_v12 }
 0xefb   : > { %v4205_v51 = vpop.f32.mrf.mxu1 }
 0xefc   : > { %v3457_v55 = vadd.f32 %v4205_v51, %v3755_v48  ;;  %v3464_v0 = vadd.f32 %v3446_v19, %v3316_v37  ;;  %v3474_v7 = vmax.f32 %v3466_v52, 0.0 }
 0xefd   : > { %v3448_v39 = vpop.f32.mrf.mxu1 }
 0xefe   : > { %v3467_v16 = vadd.f32 %v3457_v55, %v3319_v21  ;;  %v3449_v45 = vadd.f32 %v3755_v48, %v3448_v39  ;;  %v3472_v40 = vmax.f32 %v3464_v0, 0.0  ;;  %v3489_v21 = vmax.f32 %v3487_v8, %v3488_v59 }
 0xf00   : > { %v3475_v61 = vmax.f32 %v3467_v16, 0.0  ;;  %v3465_v9 = vadd.f32 %v3449_v45, %v3317_v5  ;;  %v3509_v12 = vsel %vm3508_vm5, %v3489_v21, %v3482_v50 }
 0xf02   : > { %v3497_v17 = vmax.f32 %v3474_v7, %v3475_v61  ;;  %v3473_v30 = vmax.f32 %v3465_v9, 0.0 }
 0xf04   : > { %v3498_v26 = vrot.slane %v3497_v17, 4  ;;  %v3490_v62 = vmax.f32 %v3472_v40, %v3473_v30 }
 0xf06   : > { %v3499_v27 = vmax.f32 %v3497_v17, %v3498_v26  ;;  %v3491_v23 = vrot.slane %v3490_v62, 4 }
 0xf08   : > { %v3500_v58 = vrot.slane %v3499_v27, 2  ;;  %v3492_v29 = vmax.f32 %v3490_v62, %v3491_v23 }
 0xf0a   : > { %v3501_v31 = vmax.f32 %v3499_v27, %v3500_v58  ;;  %v3493_v44 = vrot.slane %v3492_v29, 2 }
 0xf0c   : > { %v3494_v15 = vmax.f32 %v3492_v29, %v3493_v44  ;;  %v3502_v33 = vrot.slane %v3501_v31, 1 }
 0xf0e   : > { %v3495_v3 = vrot.slane %v3494_v15, 1  ;;  %v3503_v5 = vmax.f32 %v3501_v31, %v3502_v33 }
 0xf10   : > { %v3496_v37 = vmax.f32 %v3494_v15, %v3495_v3 }
 0xf12   : > { %v3511_v60 = vsel %vm3510_vm6, %v3496_v37, %v3509_v12 }
 0xf13   : > { %v3513_v13 = vsel %vm3512_vm7, %v3503_v5, %v3511_v60 }
 0xf14   : > { %3515 = vst [vmem:[%s451_s28] sm:$0xf] %v3513_v13 }
 0xf15   : > { %4744 = shalt.err (!%p4741_p3)
}
 0xf16   : > { %s4745_s30 = scalar_lea.hbm %s5691_s24, 64  ;;  %s4749_s11 = scalar_lea.hbm %s5738_s10, 128 }
 0xf17   : > { %p4746_p4 = scmp.ne.s32.totalorder %s5691_s24, %s4745_s30  ;;  %p4750_p2 = scmp.lt.s32.totalorder %s5691_s24, %s5738_s10 }
 0xf18   : > { %p4751_p7 = scmp.lt.s32.totalorder %s4749_s11, %s4745_s30 }
 0xf19   : > { %p4747_p12 = pnand %p4746_p4, %p5793_p11 }
 0xf1a   : > { %p4752_p8 = por %p4751_p7, %p4750_p2 }
 0xf1b   : > { %p4748_p6 = pneg %p4747_p12 }
 0xf1d   : > { %p4753_p10 = pnand %p4752_p8, %p4748_p6 }
 0xf1f   : > { %4756 = shalt.err (!%p4753_p10)
}
 0xf20   : > { %4228 = dma.vmem_to_hbm [thread:$0]  (%p5793_p11), %s3531_s1, 64, %s5691_s24, %s3517_s12  }
 0xf21 PF: > { %s3542_s28 = sand.u32 1, %s4795_s13   ;;  %p5794_p0 = scmp.ne.s32.totalorder %s5768_s18, 0 }
 0xf22   : > { %p5795_p13 = scmp.ge.s32.totalorder %s4807_s16, 2  ;;  %s3543_s20 = scalar_lea.sflag [#allocation4], %s3542_s28 }
 0xf24   : > { %p4251_p5 = pnand %p5795_p13, %p5794_p0 }
 0xf26   : > { %p4252_p9 = pneg %p4251_p5 }
 0xf28   : > { %4790 = dma.done.wait (%p4252_p9), %s3543_s20, 64  }
 0xf29   : > { %4792 = vsyncadd (%p4252_p9), %s3543_s20, 4294967232  ;;  %p26_p1 = scmp.ge.s32.totalorder %s4985_s26, 4   ;;  %s5796_s13 = smov %s4799_s14 }
 0xf2a   : > { %s5797_s14 = smov %s4803_s15  ;;  %s5798_s15 = smov %s4997_s17 }
 0xf2b   : > { %s5799_s16 = smov %s4985_s26  ;;  %28 = sbr.rel (!%p26_p1) target bundleno = 13 (0xd), region = 125 }
 0xf30   :  { %3548 = vsyncpa [#allocation3], 1 }
 0xf31   :  { %3550 = vsyncpa [#allocation3 + $0x1], 1 }
 0xf32   :  { %3551 = vsyncpa [#allocation6], 1 }
 0xf33   :  { %3552 = vsyncpa [#allocation9], 1 }
 0xf34   :  { %3553 = vsyncpa [#allocation12], 1 }
 0xf35   :  { %3554 = vsyncpa [#allocation4], 1 }
 0xf36   :  { %3556 = vsyncpa [#allocation4 + $0x1], 1 }

</bundles_post_ra>
